<compile_context>
chip_gen: v5e
topology: v5e:2x2
jax: 0.10.0
libtpu: 0.0.40
codegen_flags: <defaults>
</compile_context>

<pallas_src>
import functools

import jax
import jax.numpy as jnp
from jax import lax
from jax.experimental import pallas as pl
from jax.experimental.pallas import tpu as pltpu


# ----------------------------------------------------------------------------
# Helpers
# ----------------------------------------------------------------------------
def _nbytes(shape, dtype):
    n = 1
    for s in shape:
        n *= int(s)
    return n * jnp.dtype(dtype).itemsize


def _compiler_params(semantics, block_bytes, extra_bytes=0):
    # Explicit scoped-VMEM budget: double-buffered blocks + temporaries + slack,
    # clamped to [32 MiB default, 64 MiB (v7x physical)].
    est = 2 * int(block_bytes) + int(extra_bytes) + (4 << 20)
    limit = int(min(max(est, 32 << 20), 64 << 20))
    return pltpu.CompilerParams(dimension_semantics=semantics,
                                vmem_limit_bytes=limit)


# ----------------------------------------------------------------------------
# Kernel 1: importance = 1 - max(softmax(x x^T, diag masked))
#           = 1 - 1 / sum_j exp(sim_ij - max_j sim_ij)
# Row-tiled: each grid step handles tq query rows against all N key rows.
# ----------------------------------------------------------------------------
def _importance_kernel(xk_ref, xq_ref, imp_ref, *, tq):
    q = xq_ref[0]                                                    # (tq, D)
    x = xk_ref[0]                                                    # (N, D)
    # Contract the D axis of both operands directly (no transpose of x).
    sim = lax.dot_general(q, x, (((1,), (1,)), ((), ())),
                          preferred_element_type=jnp.float32)        # (tq, N)
    r = lax.broadcasted_iota(jnp.int32, sim.shape, 0)
    c = lax.broadcasted_iota(jnp.int32, sim.shape, 1)
    offset = pl.program_id(1) * tq
    # Mask the diagonal with a large finite constant (no -inf -> no NaN edge).
    sim = sim - 1e9 * (c == (r + offset)).astype(jnp.float32)
    m = jnp.max(sim, axis=-1, keepdims=True)
    s = jnp.sum(jnp.exp(sim - m), axis=-1, keepdims=True)            # (tq, 1)
    imp = 1.0 - pl.reciprocal(s, approx=True)                        # (tq, 1)
    imp_ref[...] = imp.reshape(1, 1, tq)


def _importance_scores(xp, *, tq):
    B, N, D = xp.shape
    grid = (B, pl.cdiv(N, tq))
    block_bytes = (_nbytes((N, D), xp.dtype) + _nbytes((tq, D), xp.dtype)
                   + _nbytes((1, 1, tq), jnp.float32))
    sim_tmp = 2 * _nbytes((tq, N), jnp.float32)
    imp = pl.pallas_call(
        functools.partial(_importance_kernel, tq=tq),
        out_shape=jax.ShapeDtypeStruct((B, 1, N), jnp.float32),
        grid=grid,
        in_specs=[
            pl.BlockSpec((1, N, D), lambda b, qi: (b, 0, 0)),    # all keys
            pl.BlockSpec((1, tq, D), lambda b, qi: (b, qi, 0)),  # query row tile
        ],
        out_specs=pl.BlockSpec((1, 1, tq), lambda b, qi: (b, 0, qi)),
        compiler_params=_compiler_params(("parallel", "parallel"),
                                         block_bytes, sim_tmp),
    )(xp, xp)
    return imp[:, 0, :]                                              # (B, N)


# ----------------------------------------------------------------------------
# Kernel 2: fused per-batch cross attention:
#   q = sel @ wq' + bq'   (wq'/bq' already carry 1/sqrt(depth))
#   k = x @ wk + bk ; v = x @ wv + bv
#   ctx = MHA(q, k, v)
#   out = (ctx @ wd + bd) + sel        (residual, f32)
# All intermediates (q/k/v/scores/ctx) stay in VMEM; weights are pinned via
# constant index maps so they are DMA'd once across the batch grid.
# ----------------------------------------------------------------------------
def _fused_attn_kernel(sel_ref, x_ref, wq_ref, bq_ref, wk_ref, bk_ref,
                       wv_ref, bv_ref, wd_ref, bd_ref, o_ref, *, num_heads):
    K = sel_ref.shape[1]
    N = x_ref.shape[1]
    D = sel_ref.shape[2]
    d = D // num_heads

    sel = sel_ref[0]                                                 # (K, D)
    x = x_ref[0]                                                     # (N, D)

    # Projections: f32 accumulation on MXU, cast back to compute dtype.
    q = jnp.dot(sel, wq_ref[...], preferred_element_type=jnp.float32)
    q = (q + bq_ref[...].astype(jnp.float32)).astype(sel.dtype)      # (K, D)
    kk = jnp.dot(x, wk_ref[...], preferred_element_type=jnp.float32)
    kk = (kk + bk_ref[...].astype(jnp.float32)).astype(x.dtype)      # (N, D)
    vv = jnp.dot(x, wv_ref[...], preferred_element_type=jnp.float32)
    vv = (vv + bv_ref[...].astype(jnp.float32)).astype(x.dtype)      # (N, D)

    # Split heads -> (H, rows, d); leading-batch einsums (robust lowering).
    qh = q.reshape(K, num_heads, d).transpose(1, 0, 2)               # (H, K, d)
    kh = kk.reshape(N, num_heads, d).transpose(1, 0, 2)              # (H, N, d)
    vh = vv.reshape(N, num_heads, d).transpose(1, 0, 2)              # (H, N, d)

    s = jnp.einsum('hqd,hkd->hqk', qh, kh,
                   preferred_element_type=jnp.float32)               # (H, K, N)
    m = jnp.max(s, axis=-1, keepdims=True)
    p = jnp.exp(s - m)
    p = p * pl.reciprocal(jnp.sum(p, axis=-1, keepdims=True), approx=True)
    ctx = jnp.einsum('hqk,hkd->hqd', p.astype(vh.dtype), vh,
                     preferred_element_type=jnp.float32)             # (H, K, d)
    ctx = ctx.transpose(1, 0, 2).reshape(K, D).astype(sel.dtype)     # (K, D)

    # dense + residual (f32 add, cast on store)
    y = jnp.dot(ctx, wd_ref[...], preferred_element_type=jnp.float32)
    y = y + bd_ref[...].astype(jnp.float32) + sel.astype(jnp.float32)
    o_ref[0] = y.astype(o_ref.dtype)


def _fused_attention(sel, xp, wq, bq, wk, bk, wv, bv, wd, bd, *, num_heads):
    B, K, D = sel.shape
    N = xp.shape[1]
    cdt = sel.dtype
    block_bytes = (2 * _nbytes((1, K, D), cdt) + _nbytes((1, N, D), cdt)
                   + 4 * _nbytes((D, D), cdt) + 4 * _nbytes((1, D), jnp.float32))
    tmp_bytes = (_nbytes((K + 2 * N, D), jnp.float32)
                 + 2 * _nbytes((num_heads, K, N), jnp.float32)
                 + 2 * _nbytes((K, D), jnp.float32))
    wspec = pl.BlockSpec((D, D), lambda b: (0, 0))     # constant index -> no re-DMA
    bspec = pl.BlockSpec((1, D), lambda b: (0, 0))
    return pl.pallas_call(
        functools.partial(_fused_attn_kernel, num_heads=num_heads),
        out_shape=jax.ShapeDtypeStruct((B, K, D), cdt),
        grid=(B,),
        in_specs=[
            pl.BlockSpec((1, K, D), lambda b: (b, 0, 0)),
            pl.BlockSpec((1, N, D), lambda b: (b, 0, 0)),
            wspec, bspec, wspec, bspec, wspec, bspec, wspec, bspec,
        ],
        out_specs=pl.BlockSpec((1, K, D), lambda b: (b, 0, 0)),
        compiler_params=_compiler_params(("parallel",), block_bytes, tmp_bytes),
    )(sel, xp, wq, bq, wk, bk, wv, bv, wd, bd)


# ----------------------------------------------------------------------------
# Kernel 3: generic tiled linear  y = x @ W + b  over M rows (patch_proj).
# ----------------------------------------------------------------------------
def _linear_kernel(x_ref, w_ref, b_ref, o_ref):
    acc = jnp.dot(x_ref[...], w_ref[...], preferred_element_type=jnp.float32)
    o_ref[...] = (acc + b_ref[...].astype(jnp.float32)).astype(o_ref.dtype)


def _linear(x2d, w, b, *, out_dtype, tm_max=256):
    M, Din = x2d.shape
    Dout = w.shape[1]
    tm = M if M <= 2 * tm_max else tm_max
    block_bytes = (_nbytes((tm, Din), x2d.dtype) + _nbytes((Din, Dout), w.dtype)
                   + _nbytes((1, Dout), b.dtype) + _nbytes((tm, Dout), out_dtype))
    return pl.pallas_call(
        _linear_kernel,
        out_shape=jax.ShapeDtypeStruct((M, Dout), out_dtype),
        grid=(pl.cdiv(M, tm),),
        in_specs=[
            pl.BlockSpec((tm, Din), lambda i: (i, 0)),
            pl.BlockSpec((Din, Dout), lambda i: (0, 0)),   # constant index -> no re-DMA
            pl.BlockSpec((1, Dout), lambda i: (0, 0)),
        ],
        out_specs=pl.BlockSpec((tm, Dout), lambda i: (i, 0)),
        compiler_params=_compiler_params(("parallel",), block_bytes,
                                         _nbytes((tm, Dout), jnp.float32)),
    )(x2d, w, b)


# ----------------------------------------------------------------------------
# Forward wrapper
# ----------------------------------------------------------------------------
def token_filter_forward(x, params, *, k, num_heads, compute_dtype=jnp.bfloat16):
    """x: (B, N, D) or (N, D) -> (B, k, out_channels) (or (k, out_channels))."""
    squeeze = (x.ndim == 2)
    if squeeze:
        x = x[None]
    B, N, D = x.shape
    Dout = params['wp'].shape[1]
    assert D % num_heads == 0
    depth = D // num_heads
    cdt = compute_dtype

    # x + positional embedding; kept in bf16 (f32 accumulation happens inside
    # the matmuls via preferred_element_type).
    xp = (x.astype(jnp.float32) + params['pos_emb'].astype(jnp.float32)).astype(cdt)

    # --- importance scores (Pallas, row-tiled) ---
    tq = N if N <= 1024 else 256
    importance = _importance_scores(xp, tq=tq)                       # (B, N) f32

    # --- top-k + gather (data-dependent indexing stays in plain JAX) ---
    # TODO(synk): the gather could move into the fused kernel via scalar-prefetch
    # indices; kept as a single XLA gather since `selected` is tiny and the
    # residual needs it anyway.
    _, topk_idx = jax.lax.top_k(importance, k)                       # (B, k)
    sel = jnp.take_along_axis(xp, topk_idx[..., None], axis=1)       # (B, k, D)

    # --- weights: bf16 operands, f32 biases, 1/sqrt(depth) folded into wq ---
    scale = 1.0 / (depth ** 0.5)
    wq = (params['wq'].astype(jnp.float32) * scale).astype(cdt)
    bq = params['bq'].astype(jnp.float32) * scale
    wk = params['wk'].astype(cdt)
    wv = params['wv'].astype(cdt)
    wd = params['wd'].astype(cdt)
    wpp = params['wp'].astype(cdt)
    bk = params['bk'].astype(jnp.float32)
    bv = params['bv'].astype(jnp.float32)
    bd = params['bd'].astype(jnp.float32)
    bp = params['bp'].astype(jnp.float32)

    # --- fused per-batch q/k/v proj + MHA + dense + residual (Pallas) ---
    pooled = _fused_attention(sel, xp, wq, bq, wk, bk, wv, bv, wd, bd,
                              num_heads=num_heads)                   # (B, k, D)

    # --- output projection (Pallas, lane-dense big matmul over B*k rows) ---
    out = _linear(pooled.reshape(B * k, D), wpp, bp, out_dtype=jnp.float32)
    out = out.reshape(B, k, Dout)
    if squeeze:
        out = out[0]
    return out


# ----------------------------------------------------------------------------
# Deterministic parameter init (synthetic; not a checkpoint load)
# ----------------------------------------------------------------------------
def init_params(key, *, input_tokens, in_channels, out_channels):
    ks = jax.random.split(key, 11)
    D, Dout, N = in_channels, out_channels, input_tokens
    s = 0.02
    return {
        'pos_emb': s * jax.random.truncated_normal(ks[0], -2.0, 2.0, (1, N, D), jnp.float32),
        'wq': s * jax.random.normal(ks[1], (D, D), jnp.float32),
        'bq': s * jax.random.normal(ks[2], (1, D), jnp.float32),
        'wk': s * jax.random.normal(ks[3], (D, D), jnp.float32),
        'bk': s * jax.random.normal(ks[4], (1, D), jnp.float32),
        'wv': s * jax.random.normal(ks[5], (D, D), jnp.float32),
        'bv': s * jax.random.normal(ks[6], (1, D), jnp.float32),
        'wd': s * jax.random.normal(ks[7], (D, D), jnp.float32),
        'bd': s * jax.random.normal(ks[8], (1, D), jnp.float32),
        'wp': s * jax.random.normal(ks[9], (D, Dout), jnp.float32),
        'bp': s * jax.random.normal(ks[10], (1, Dout), jnp.float32),
    }


if __name__ == "__main__":
    # Small shapes consistent with TokenFilter(k, input_tokens, in_channels,
    # out_channels, num_heads) semantics.
    B, N, D, DOUT, K, H = 2, 16, 64, 128, 8, 4

    key = jax.random.PRNGKey(0)
    pkey, xkey = jax.random.split(key)
    params = init_params(pkey, input_tokens=N, in_channels=D, out_channels=DOUT)
    x = jax.random.normal(xkey, (B, N, D), jnp.float32)

    fwd = jax.jit(functools.partial(token_filter_forward, k=K, num_heads=H))
    out = fwd(x, params)
    out = jax.block_until_ready(out)

    assert out.shape == (B, K, DOUT), out.shape
    assert bool(jnp.all(jnp.isfinite(out)))
    print("KERNEL_OK")
</pallas_src>

<mosaic_0001>
module attributes {stable_mosaic.version = 11 : i64} {
  func.func @_importance_kernel(%arg0: i32, %arg1: i32, %arg2: memref<1x16x64xbf16, #tpu.memory_space<vmem>>, %arg3: memref<1x16x64xbf16, #tpu.memory_space<vmem>>, %arg4: memref<1x1x16xf32, #tpu.memory_space<vmem>>) attributes {dimension_semantics = [#tpu.dimension_semantics<parallel>, #tpu.dimension_semantics<parallel>], iteration_bounds = array<i64: 2, 1>, scalar_prefetch = 0 : i64, scratch_operands = 0 : i64, tpu.core_type = #tpu.core_type<tc>, window_params = [{transform_indices = @transform_0, window_bounds = array<i64: 1, 16, 64>}, {transform_indices = @transform_1, window_bounds = array<i64: 1, 16, 64>}, {transform_indices = @transform_2, window_bounds = array<i64: 1, 1, 16>}]} {
    %c0 = arith.constant 0 : index
    %c0_0 = arith.constant 0 : index
    %c0_1 = arith.constant 0 : index
    %0 = vector.load %arg3[%c0, %c0_0, %c0_1] : memref<1x16x64xbf16, #tpu.memory_space<vmem>>, vector<1x16x64xbf16>
    %1 = vector.shape_cast %0 : vector<1x16x64xbf16> to vector<16x64xbf16>
    %c0_2 = arith.constant 0 : index
    %c0_3 = arith.constant 0 : index
    %c0_4 = arith.constant 0 : index
    %2 = vector.load %arg2[%c0_2, %c0_3, %c0_4] : memref<1x16x64xbf16, #tpu.memory_space<vmem>>, vector<1x16x64xbf16>
    %3 = vector.shape_cast %2 : vector<1x16x64xbf16> to vector<16x64xbf16>
    %cst = arith.constant dense<0.000000e+00> : vector<16x16xf32>
    %4 = tpu.matmul %1, %3, %cst {dimension_numbers = #tpu.dot_dimension_numbers<[1], [1], [0], [0], [0, 0, 1, 0], [], []>} : vector<16x64xbf16>, vector<16x64xbf16>, vector<16x16xf32> -> vector<16x16xf32>
    %5 = tpu.iota {dimensions = array<i32: 0>} : vector<16x16xi32>
    %6 = tpu.iota {dimensions = array<i32: 1>} : vector<16x16xi32>
    %c16_i32 = arith.constant 16 : i32
    %7 = arith.muli %arg1, %c16_i32 : i32
    %8 = vector.broadcast %7 : i32 to vector<16x16xi32>
    %9 = arith.addi %5, %8 : vector<16x16xi32>
    %10 = arith.cmpi eq, %6, %9 : vector<16x16xi32>
    %11 = arith.extui %10 : vector<16x16xi1> to vector<16x16xi32>
    %12 = arith.sitofp %11 : vector<16x16xi32> to vector<16x16xf32>
    %cst_5 = arith.constant 1.000000e+09 : f32
    %13 = vector.broadcast %cst_5 : f32 to vector<16x16xf32>
    %14 = arith.mulf %13, %12 : vector<16x16xf32>
    %15 = arith.subf %4, %14 : vector<16x16xf32>
    %cst_6 = arith.constant dense<0xFF800000> : vector<16xf32>
    %16 = vector.multi_reduction <maximumf>, %15, %cst_6 [1] : vector<16x16xf32> to vector<16xf32>
    %17 = vector.shape_cast %16 : vector<16xf32> to vector<16x1xf32>
    %18 = vector.broadcast %17 : vector<16x1xf32> to vector<16x16xf32>
    %19 = arith.subf %15, %18 : vector<16x16xf32>
    %20 = math.exp %19 : vector<16x16xf32>
    %cst_7 = arith.constant dense<0.000000e+00> : vector<16xf32>
    %21 = vector.multi_reduction <add>, %20, %cst_7 [1] : vector<16x16xf32> to vector<16xf32>
    %22 = vector.shape_cast %21 : vector<16xf32> to vector<16x1xf32>
    %23 = tpu.reciprocal %22 {approx = true} : vector<16x1xf32> -> vector<16x1xf32>
    %cst_8 = arith.constant 1.000000e+00 : f32
    %24 = vector.broadcast %cst_8 : f32 to vector<16x1xf32>
    %25 = arith.subf %24, %23 : vector<16x1xf32>
    %26 = vector.shape_cast %25 : vector<16x1xf32> to vector<1x1x16xf32>
    %c0_9 = arith.constant 0 : index
    %c0_10 = arith.constant 0 : index
    %c0_11 = arith.constant 0 : index
    %27 = vector.load %arg4[%c0_9, %c0_10, %c0_11] : memref<1x1x16xf32, #tpu.memory_space<vmem>>, vector<1x1x16xf32>
    tpu.vector_store %arg4[%c0_9, %c0_10, %c0_11], %26 {strides = array<i32>} : memref<1x1x16xf32, #tpu.memory_space<vmem>>, vector<1x1x16xf32>,
    return
  }
  func.func @transform_0(%arg0: i32, %arg1: i32) -> (i32, i32, i32) {
    %c0_i32 = arith.constant 0 : i32
    %c0_i32_0 = arith.constant 0 : i32
    %c0_i32_1 = arith.constant 0 : i32
    return %arg0, %c0_i32, %c0_i32_0 : i32, i32, i32
  }
  func.func @transform_1(%arg0: i32, %arg1: i32) -> (i32, i32, i32) {
    %c0_i32 = arith.constant 0 : i32
    %c0_i32_0 = arith.constant 0 : i32
    return %arg0, %arg1, %c0_i32 : i32, i32, i32
  }
  func.func @transform_2(%arg0: i32, %arg1: i32) -> (i32, i32, i32) {
    %c0_i32 = arith.constant 0 : i32
    %c0_i32_0 = arith.constant 0 : i32
    return %arg0, %c0_i32, %arg1 : i32, i32, i32
  }
}

module attributes {stable_mosaic.version = 11 : i64} {
  func.func @_linear_kernel(%arg0: i32, %arg1: memref<16x64xbf16, #tpu.memory_space<vmem>>, %arg2: memref<64x128xbf16, #tpu.memory_space<vmem>>, %arg3: memref<1x128xf32, #tpu.memory_space<vmem>>, %arg4: memref<16x128xf32, #tpu.memory_space<vmem>>) attributes {dimension_semantics = [#tpu.dimension_semantics<parallel>], iteration_bounds = array<i64: 1>, scalar_prefetch = 0 : i64, scratch_operands = 0 : i64, tpu.core_type = #tpu.core_type<tc>, window_params = [{transform_indices = @transform_0, window_bounds = array<i64: 16, 64>}, {pipeline_mode = #tpu.pipeline_mode<synchronous>, transform_indices = @transform_1, window_bounds = array<i64: 64, 128>}, {pipeline_mode = #tpu.pipeline_mode<synchronous>, transform_indices = @transform_2, window_bounds = array<i64: 1, 128>}, {transform_indices = @transform_3, window_bounds = array<i64: 16, 128>}]} {
    %c0 = arith.constant 0 : index
    %c0_0 = arith.constant 0 : index
    %0 = vector.load %arg1[%c0, %c0_0] : memref<16x64xbf16, #tpu.memory_space<vmem>>, vector<16x64xbf16>
    %c0_1 = arith.constant 0 : index
    %c0_2 = arith.constant 0 : index
    %1 = vector.load %arg2[%c0_1, %c0_2] : memref<64x128xbf16, #tpu.memory_space<vmem>>, vector<64x128xbf16>
    %cst = arith.constant dense<0.000000e+00> : vector<16x128xf32>
    %2 = tpu.matmul %0, %1, %cst {dimension_numbers = #tpu.dot_dimension_numbers<[1], [0], [0], [1], [0, 0, 1, 1], [], []>} : vector<16x64xbf16>, vector<64x128xbf16>, vector<16x128xf32> -> vector<16x128xf32>
    %c0_3 = arith.constant 0 : index
    %c0_4 = arith.constant 0 : index
    %3 = vector.load %arg3[%c0_3, %c0_4] : memref<1x128xf32, #tpu.memory_space<vmem>>, vector<1x128xf32>
    %4 = vector.broadcast %3 : vector<1x128xf32> to vector<16x128xf32>
    %5 = arith.addf %2, %4 : vector<16x128xf32>
    %c0_5 = arith.constant 0 : index
    %c0_6 = arith.constant 0 : index
    %6 = vector.load %arg4[%c0_5, %c0_6] : memref<16x128xf32, #tpu.memory_space<vmem>>, vector<16x128xf32>
    tpu.vector_store %arg4[%c0_5, %c0_6], %5 {strides = array<i32>} : memref<16x128xf32, #tpu.memory_space<vmem>>, vector<16x128xf32>,
    return
  }
  func.func @transform_0(%arg0: i32) -> (i32, i32) {
    %c0_i32 = arith.constant 0 : i32
    %c0_i32_0 = arith.constant 0 : i32
    return %arg0, %c0_i32 : i32, i32
  }
  func.func @transform_1(%arg0: i32) -> (i32, i32) {
    %c0_i32 = arith.constant 0 : i32
    %c0_i32_0 = arith.constant 0 : i32
    %c0_i32_1 = arith.constant 0 : i32
    return %c0_i32, %c0_i32_0 : i32, i32
  }
  func.func @transform_2(%arg0: i32) -> (i32, i32) {
    %c0_i32 = arith.constant 0 : i32
    %c0_i32_0 = arith.constant 0 : i32
    %c0_i32_1 = arith.constant 0 : i32
    return %c0_i32, %c0_i32_0 : i32, i32
  }
  func.func @transform_3(%arg0: i32) -> (i32, i32) {
    %c0_i32 = arith.constant 0 : i32
    %c0_i32_0 = arith.constant 0 : i32
    return %arg0, %c0_i32 : i32, i32
  }
}

module attributes {stable_mosaic.version = 11 : i64} {
  func.func @_fused_attn_kernel(%arg0: i32, %arg1: memref<1x8x64xbf16, #tpu.memory_space<vmem>>, %arg2: memref<1x16x64xbf16, #tpu.memory_space<vmem>>, %arg3: memref<64x64xbf16, #tpu.memory_space<vmem>>, %arg4: memref<1x64xf32, #tpu.memory_space<vmem>>, %arg5: memref<64x64xbf16, #tpu.memory_space<vmem>>, %arg6: memref<1x64xf32, #tpu.memory_space<vmem>>, %arg7: memref<64x64xbf16, #tpu.memory_space<vmem>>, %arg8: memref<1x64xf32, #tpu.memory_space<vmem>>, %arg9: memref<64x64xbf16, #tpu.memory_space<vmem>>, %arg10: memref<1x64xf32, #tpu.memory_space<vmem>>, %arg11: memref<1x8x64xbf16, #tpu.memory_space<vmem>>) attributes {dimension_semantics = [#tpu.dimension_semantics<parallel>], iteration_bounds = array<i64: 2>, scalar_prefetch = 0 : i64, scratch_operands = 0 : i64, tpu.core_type = #tpu.core_type<tc>, window_params = [{transform_indices = @transform_0, window_bounds = array<i64: 1, 8, 64>}, {transform_indices = @transform_1, window_bounds = array<i64: 1, 16, 64>}, {pipeline_mode = #tpu.pipeline_mode<synchronous>, transform_indices = @transform_2, window_bounds = array<i64: 64, 64>}, {pipeline_mode = #tpu.pipeline_mode<synchronous>, transform_indices = @transform_3, window_bounds = array<i64: 1, 64>}, {pipeline_mode = #tpu.pipeline_mode<synchronous>, transform_indices = @transform_4, window_bounds = array<i64: 64, 64>}, {pipeline_mode = #tpu.pipeline_mode<synchronous>, transform_indices = @transform_5, window_bounds = array<i64: 1, 64>}, {pipeline_mode = #tpu.pipeline_mode<synchronous>, transform_indices = @transform_6, window_bounds = array<i64: 64, 64>}, {pipeline_mode = #tpu.pipeline_mode<synchronous>, transform_indices = @transform_7, window_bounds = array<i64: 1, 64>}, {pipeline_mode = #tpu.pipeline_mode<synchronous>, transform_indices = @transform_8, window_bounds = array<i64: 64, 64>}, {pipeline_mode = #tpu.pipeline_mode<synchronous>, transform_indices = @transform_9, window_bounds = array<i64: 1, 64>}, {transform_indices = @transform_10, window_bounds = array<i64: 1, 8, 64>}]} {
    %c0 = arith.constant 0 : index
    %c0_0 = arith.constant 0 : index
    %c0_1 = arith.constant 0 : index
    %0 = vector.load %arg1[%c0, %c0_0, %c0_1] : memref<1x8x64xbf16, #tpu.memory_space<vmem>>, vector<1x8x64xbf16>
    %1 = vector.shape_cast %0 : vector<1x8x64xbf16> to vector<8x64xbf16>
    %c0_2 = arith.constant 0 : index
    %c0_3 = arith.constant 0 : index
    %c0_4 = arith.constant 0 : index
    %2 = vector.load %arg2[%c0_2, %c0_3, %c0_4] : memref<1x16x64xbf16, #tpu.memory_space<vmem>>, vector<1x16x64xbf16>
    %3 = vector.shape_cast %2 : vector<1x16x64xbf16> to vector<16x64xbf16>
    %c0_5 = arith.constant 0 : index
    %c0_6 = arith.constant 0 : index
    %4 = vector.load %arg3[%c0_5, %c0_6] : memref<64x64xbf16, #tpu.memory_space<vmem>>, vector<64x64xbf16>
    %cst = arith.constant dense<0.000000e+00> : vector<8x64xf32>
    %5 = tpu.matmul %1, %4, %cst {dimension_numbers = #tpu.dot_dimension_numbers<[1], [0], [0], [1], [0, 0, 1, 1], [], []>} : vector<8x64xbf16>, vector<64x64xbf16>, vector<8x64xf32> -> vector<8x64xf32>
    %c0_7 = arith.constant 0 : index
    %c0_8 = arith.constant 0 : index
    %6 = vector.load %arg4[%c0_7, %c0_8] : memref<1x64xf32, #tpu.memory_space<vmem>>, vector<1x64xf32>
    %7 = vector.broadcast %6 : vector<1x64xf32> to vector<8x64xf32>
    %8 = arith.addf %5, %7 : vector<8x64xf32>
    %9 = arith.truncf %8 : vector<8x64xf32> to vector<8x64xbf16>
    %c0_9 = arith.constant 0 : index
    %c0_10 = arith.constant 0 : index
    %10 = vector.load %arg5[%c0_9, %c0_10] : memref<64x64xbf16, #tpu.memory_space<vmem>>, vector<64x64xbf16>
    %cst_11 = arith.constant dense<0.000000e+00> : vector<16x64xf32>
    %11 = tpu.matmul %3, %10, %cst_11 {dimension_numbers = #tpu.dot_dimension_numbers<[1], [0], [0], [1], [0, 0, 1, 1], [], []>} : vector<16x64xbf16>, vector<64x64xbf16>, vector<16x64xf32> -> vector<16x64xf32>
    %c0_12 = arith.constant 0 : index
    %c0_13 = arith.constant 0 : index
    %12 = vector.load %arg6[%c0_12, %c0_13] : memref<1x64xf32, #tpu.memory_space<vmem>>, vector<1x64xf32>
    %13 = vector.broadcast %12 : vector<1x64xf32> to vector<16x64xf32>
    %14 = arith.addf %11, %13 : vector<16x64xf32>
    %15 = arith.truncf %14 : vector<16x64xf32> to vector<16x64xbf16>
    %c0_14 = arith.constant 0 : index
    %c0_15 = arith.constant 0 : index
    %16 = vector.load %arg7[%c0_14, %c0_15] : memref<64x64xbf16, #tpu.memory_space<vmem>>, vector<64x64xbf16>
    %cst_16 = arith.constant dense<0.000000e+00> : vector<16x64xf32>
    %17 = tpu.matmul %3, %16, %cst_16 {dimension_numbers = #tpu.dot_dimension_numbers<[1], [0], [0], [1], [0, 0, 1, 1], [], []>} : vector<16x64xbf16>, vector<64x64xbf16>, vector<16x64xf32> -> vector<16x64xf32>
    %c0_17 = arith.constant 0 : index
    %c0_18 = arith.constant 0 : index
    %18 = vector.load %arg8[%c0_17, %c0_18] : memref<1x64xf32, #tpu.memory_space<vmem>>, vector<1x64xf32>
    %19 = vector.broadcast %18 : vector<1x64xf32> to vector<16x64xf32>
    %20 = arith.addf %17, %19 : vector<16x64xf32>
    %21 = arith.truncf %20 : vector<16x64xf32> to vector<16x64xbf16>
    %22 = vector.shape_cast %9 : vector<8x64xbf16> to vector<8x4x16xbf16>
    %23 = tpu.transpose %22, [1, 0, 2] : vector<8x4x16xbf16> -> vector<4x8x16xbf16>
    %24 = vector.shape_cast %15 : vector<16x64xbf16> to vector<16x4x16xbf16>
    %25 = tpu.transpose %24, [1, 0, 2] : vector<16x4x16xbf16> -> vector<4x16x16xbf16>
    %26 = vector.shape_cast %21 : vector<16x64xbf16> to vector<16x4x16xbf16>
    %27 = tpu.transpose %26, [1, 0, 2] : vector<16x4x16xbf16> -> vector<4x16x16xbf16>
    "tpu.trace_start"() <{level = 10 : i32, message = "hqd,hkd->hqk"}> : () -> ()
    %cst_19 = arith.constant dense<0.000000e+00> : vector<4x8x16xf32>
    %28 = tpu.matmul %23, %25, %cst_19 {dimension_numbers = #tpu.dot_dimension_numbers<[2], [2], [1], [1], [0, 0, 0, 1, 1, 1], [0], [0]>} : vector<4x8x16xbf16>, vector<4x16x16xbf16>, vector<4x8x16xf32> -> vector<4x8x16xf32>
    "tpu.trace_stop"() : () -> ()
    %cst_20 = arith.constant dense<0xFF800000> : vector<4x8xf32>
    %29 = vector.multi_reduction <maximumf>, %28, %cst_20 [2] : vector<4x8x16xf32> to vector<4x8xf32>
    %30 = vector.shape_cast %29 : vector<4x8xf32> to vector<4x8x1xf32>
    %31 = vector.broadcast %30 : vector<4x8x1xf32> to vector<4x8x16xf32>
    %32 = arith.subf %28, %31 : vector<4x8x16xf32>
    %33 = math.exp %32 : vector<4x8x16xf32>
    %cst_21 = arith.constant dense<0.000000e+00> : vector<4x8xf32>
    %34 = vector.multi_reduction <add>, %33, %cst_21 [2] : vector<4x8x16xf32> to vector<4x8xf32>
    %35 = vector.shape_cast %34 : vector<4x8xf32> to vector<4x8x1xf32>
    %36 = tpu.reciprocal %35 {approx = true} : vector<4x8x1xf32> -> vector<4x8x1xf32>
    %37 = vector.broadcast %36 : vector<4x8x1xf32> to vector<4x8x16xf32>
    %38 = arith.mulf %33, %37 : vector<4x8x16xf32>
    %39 = arith.truncf %38 : vector<4x8x16xf32> to vector<4x8x16xbf16>
    "tpu.trace_start"() <{level = 10 : i32, message = "hqk,hkd->hqd"}> : () -> ()
    %cst_22 = arith.constant dense<0.000000e+00> : vector<4x8x16xf32>
    %40 = tpu.matmul %39, %27, %cst_22 {dimension_numbers = #tpu.dot_dimension_numbers<[2], [1], [1], [2], [0, 0, 0, 1, 1, 2], [0], [0]>} : vector<4x8x16xbf16>, vector<4x16x16xbf16>, vector<4x8x16xf32> -> vector<4x8x16xf32>
    "tpu.trace_stop"() : () -> ()
    %41 = tpu.transpose %40, [1, 0, 2] : vector<4x8x16xf32> -> vector<8x4x16xf32>
    %42 = vector.shape_cast %41 : vector<8x4x16xf32> to vector<8x64xf32>
    %43 = arith.truncf %42 : vector<8x64xf32> to vector<8x64xbf16>
    %c0_23 = arith.constant 0 : index
    %c0_24 = arith.constant 0 : index
    %44 = vector.load %arg9[%c0_23, %c0_24] : memref<64x64xbf16, #tpu.memory_space<vmem>>, vector<64x64xbf16>
    %cst_25 = arith.constant dense<0.000000e+00> : vector<8x64xf32>
    %45 = tpu.matmul %43, %44, %cst_25 {dimension_numbers = #tpu.dot_dimension_numbers<[1], [0], [0], [1], [0, 0, 1, 1], [], []>} : vector<8x64xbf16>, vector<64x64xbf16>, vector<8x64xf32> -> vector<8x64xf32>
    %c0_26 = arith.constant 0 : index
    %c0_27 = arith.constant 0 : index
    %46 = vector.load %arg10[%c0_26, %c0_27] : memref<1x64xf32, #tpu.memory_space<vmem>>, vector<1x64xf32>
    %47 = vector.broadcast %46 : vector<1x64xf32> to vector<8x64xf32>
    %48 = arith.addf %45, %47 : vector<8x64xf32>
    %49 = arith.extf %1 : vector<8x64xbf16> to vector<8x64xf32>
    %50 = arith.addf %48, %49 : vector<8x64xf32>
    %51 = arith.truncf %50 : vector<8x64xf32> to vector<8x64xbf16>
    %c0_28 = arith.constant 0 : index
    %c0_29 = arith.constant 0 : index
    %c0_30 = arith.constant 0 : index
    %52 = vector.load %arg11[%c0_28, %c0_29, %c0_30] : memref<1x8x64xbf16, #tpu.memory_space<vmem>>, vector<1x8x64xbf16>
    %53 = vector.shape_cast %52 : vector<1x8x64xbf16> to vector<8x64xbf16>
    %54 = vector.shape_cast %51 : vector<8x64xbf16> to vector<1x8x64xbf16>
    tpu.vector_store %arg11[%c0_28, %c0_29, %c0_30], %54 {strides = array<i32>} : memref<1x8x64xbf16, #tpu.memory_space<vmem>>, vector<1x8x64xbf16>,
    return
  }
  func.func @transform_0(%arg0: i32) -> (i32, i32, i32) {
    %c0_i32 = arith.constant 0 : i32
    %c0_i32_0 = arith.constant 0 : i32
    %c0_i32_1 = arith.constant 0 : i32
    return %arg0, %c0_i32, %c0_i32_0 : i32, i32, i32
  }
  func.func @transform_1(%arg0: i32) -> (i32, i32, i32) {
    %c0_i32 = arith.constant 0 : i32
    %c0_i32_0 = arith.constant 0 : i32
    %c0_i32_1 = arith.constant 0 : i32
    return %arg0, %c0_i32, %c0_i32_0 : i32, i32, i32
  }
  func.func @transform_2(%arg0: i32) -> (i32, i32) {
    %c0_i32 = arith.constant 0 : i32
    %c0_i32_0 = arith.constant 0 : i32
    %c0_i32_1 = arith.constant 0 : i32
    return %c0_i32, %c0_i32_0 : i32, i32
  }
  func.func @transform_3(%arg0: i32) -> (i32, i32) {
    %c0_i32 = arith.constant 0 : i32
    %c0_i32_0 = arith.constant 0 : i32
    %c0_i32_1 = arith.constant 0 : i32
    return %c0_i32, %c0_i32_0 : i32, i32
  }
  func.func @transform_4(%arg0: i32) -> (i32, i32) {
    %c0_i32 = arith.constant 0 : i32
    %c0_i32_0 = arith.constant 0 : i32
    %c0_i32_1 = arith.constant 0 : i32
    return %c0_i32, %c0_i32_0 : i32, i32
  }
  func.func @transform_5(%arg0: i32) -> (i32, i32) {
    %c0_i32 = arith.constant 0 : i32
    %c0_i32_0 = arith.constant 0 : i32
    %c0_i32_1 = arith.constant 0 : i32
    return %c0_i32, %c0_i32_0 : i32, i32
  }
  func.func @transform_6(%arg0: i32) -> (i32, i32) {
    %c0_i32 = arith.constant 0 : i32
    %c0_i32_0 = arith.constant 0 : i32
    %c0_i32_1 = arith.constant 0 : i32
    return %c0_i32, %c0_i32_0 : i32, i32
  }
  func.func @transform_7(%arg0: i32) -> (i32, i32) {
    %c0_i32 = arith.constant 0 : i32
    %c0_i32_0 = arith.constant 0 : i32
    %c0_i32_1 = arith.constant 0 : i32
    return %c0_i32, %c0_i32_0 : i32, i32
  }
  func.func @transform_8(%arg0: i32) -> (i32, i32) {
    %c0_i32 = arith.constant 0 : i32
    %c0_i32_0 = arith.constant 0 : i32
    %c0_i32_1 = arith.constant 0 : i32
    return %c0_i32, %c0_i32_0 : i32, i32
  }
  func.func @transform_9(%arg0: i32) -> (i32, i32) {
    %c0_i32 = arith.constant 0 : i32
    %c0_i32_0 = arith.constant 0 : i32
    %c0_i32_1 = arith.constant 0 : i32
    return %c0_i32, %c0_i32_0 : i32, i32
  }
  func.func @transform_10(%arg0: i32) -> (i32, i32, i32) {
    %c0_i32 = arith.constant 0 : i32
    %c0_i32_0 = arith.constant 0 : i32
    %c0_i32_1 = arith.constant 0 : i32
    return %arg0, %c0_i32, %c0_i32_0 : i32, i32, i32
  }
}

</mosaic_0001>

<bundles_post_ra>
// kernel: token_filter_forward.3
= control target key start
LH: loop header
LB: loop body
LE: loop exit
PB: predicated region body
PF: predicated region fallthrough
CT: control target
= control target key end

     0   :  { %s466_s9 = smov 0   ;;  %s468_s10 = smov 0   ;;  %s510_s0 = inlined_call_operand.vmem [shape: bf16[2,16,64], index: 0, kind: input, shape index: {}, may-alias: {0,1}]   ;;  %s511_s1 = inlined_call_operand.vmem [shape: bf16[2,16,64], index: 1, kind: input, shape index: {}, may-alias: {0,1}]   ;;  %s512_s2 = inlined_call_operand.vmem [shape: f32[2,1,16], index: 2, kind: output, shape index: {}]  }
   0x1   :  { %s470_s11 = smov 0  }
   0x2 LB: > { %s24_s12 = sadd.s32 1, %s444_s10  ;;  %p371_p0 = scmp.ge.s32.totalorder %s448_s11, 1  ;;  %s448_s11 = sphi %s470_s11, %s12_s11   ;;  %s444_s10 = sphi %s468_s10, %s514_s10   ;;  %s440_s9 = sphi %s466_s9, %s513_s9  }
   0x3   : > { %p26_p1 = scmp.ge.s32.totalorder %s24_s12, 2  ;;  %p143_p2 = scmp.lt.s32.totalorder %s448_s11, 3 }
   0x5   : > { %s516_s12 = smov (%p26_p1, %s24_s12), 0  ;;  %p144_p3 = pnand %p371_p0, %p143_p2 }
   0x6   : > { %p175_p4 = scmp.lt.s32.totalorder (!%p144_p3), %s440_s9, 1 }
   0x7   : > { %147 = sbr.rel (%p144_p3) target bundleno = 418 (0x1a2), region = 28 }
   0xc   : > { %s518_s9 = smov (!%p175_p4, %s440_s9), 1  ;;  %vm211_vm0 = vcmask 523264   ;;  %v232_v3 = vlaneseq  ;;  %v450_v6 = vmov 0.0   ;;  %vm251_vm3 = vcmask 130048  }
   0xd   : > { %s389_s13 = sshll.u32 %s518_s9, 3  ;;  %vm279_vm4 = vcmask 130112   ;;  %s195_s22 = scalar_lea.vmem %s512_s2, %s518_s9  ;;  %vm282_vm5 = vcmask 122880  }
   0xe   : > { %s179_s16 = scalar_lea.vmem %s510_s0, %s389_s13  ;;  %s188_s19 = scalar_lea.vmem %s511_s1, %s389_s13  ;;  %v233_v4 = vshrl.u32 %v232_v3, 7  ;;  %v236_v5 = vand.u32 127, %v232_v3 }
   0xf   : > { %v392_v0 = vld [vmem:[%s179_s16] sm:$0xff] }
  0x10   : > { %v216_v1 = vsel %vm211_vm0, %v392_v0, 0  ;;  %v391_v2 = vld [vmem:[%s188_s19] sm:$0xff]  ;;  %vm241_vm1 = vcmp.eq.s32.totalorder %v236_v5, %v233_v4  ;;  %v234_v8 = vadd.s32 8, %v233_v4  ;;  %v277_v32 = vadd.s32 4294967288, %v236_v5 }
  0x11   : > { %225 = vmatpush.bf16.xpose.msra.mxu0 %v216_v1  ;;  %v385_v7 = vsel %vm241_vm1, 1.0, %v450_v6 }
  0x12   : > { %v247_v9 = vmul.f32 1e+09, %v385_v7  ;;  %vm242_vm2 = vcmp.eq.s32.totalorder %v236_v5, %v234_v8 }
  0x13   : > { %v386_v12 = vsel %vm242_vm2, 1.0, %v450_v6 }
  0x14   : > { %v248_v14 = vmul.f32 1e+09, %v386_v12 }
  0x18   : > { %384 = vmatmul.msk.bf16.vlgmr.msra.gmra.mxu0 %vm211_vm0, %v391_v2 }
  0x95   : > { %v227_v10 = vpop.f32.mrf.mxu0 }
  0x96   : > { %v249_v11 = vsub.f32 %v227_v10, %v247_v9 }
  0x98   : > { %v252_v13 = vsel %vm251_vm3, %v249_v11, -inf }
  0x99   : > { %253 = vmax.xlane.f32.xlu0 %v252_v13 }
  0x9d   : > { %v229_v15 = vpop.f32.mrf.mxu0 }
  0x9e   : > { %v250_v16 = vsub.f32 %v229_v15, %v248_v14 }
  0xa0   : > { %v255_v17 = vsel %vm251_vm3, %v250_v16, -inf }
  0xa1   : > { %256 = vmax.xlane.f32.xlu0 %v255_v17 }
 0x10c   : > { %v254_v18 = vpop.xlane.xlu0 %253 }
 0x10d   : > { %v258_v19 = vsub.f32 %v249_v11, %v254_v18 }
 0x10f   : > { %v260_v20 = vmul.f32 1.442695, %v258_v19 }
 0x111   : > { %418 = vpow2.f32 %v260_v20 }
 0x114   : > { %v257_v21 = vpop.xlane.xlu0 %256 }
 0x115   : > { %v259_v22 = vsub.f32 %v250_v16, %v257_v21 }
 0x117   : > { %v419_v23 = vpop.eup %418  ;;  %v262_v24 = vmul.f32 1.442695, %v259_v22 }
 0x118   : > { %v264_v25 = vsel %vm251_vm3, %v419_v23, 0.0 }
 0x119   : > { %420 = vpow2.f32 %v262_v24  ;;  %265 = vadd.xlane.f32.xlu1 %v264_v25 }
 0x11f   : > { %v421_v26 = vpop.eup %420 }
 0x120   : > { %v267_v27 = vsel %vm251_vm3, %v421_v26, 0.0 }
 0x121   : > { %268 = vadd.xlane.f32.xlu1 %v267_v27 }
 0x18c   : > { %v266_v28 = vpop.xlane.xlu1 %265 }
 0x18d   : > { %422 = vrcp.f32 %v266_v28 }
 0x193   : > { %v423_v30 = vpop.eup %422 }
 0x194   : > { %v269_v29 = vpop.xlane.xlu1 %268  ;;  %v272_v31 = vsub.f32 1.0, %v423_v30 }
 0x195   : > { %424 = vrcp.f32 %v269_v29 }
 0x196   : > { %v276_v35 = vperm.slane %v272_v31, %v236_v5 }
 0x19b   : > { %v425_v33 = vpop.eup %424 }
 0x19c   : > { %v273_v34 = vsub.f32 1.0, %v425_v33 }
 0x19e   : > { %v278_v36 = vperm.slane %v273_v34, %v277_v32 }
 0x1a0   : > { %v280_v37 = vsel %vm279_vm4, %v278_v36, %v276_v35 }
 0x1a1   : > { %283 = vst.msk [vmem:[%s195_s22] sm:$0x1] %vm282_vm5, %v280_v37 }
 0x1a2 PF: > { %s12_s11 = sadd.s32 1, %s448_s11   ;;  %s513_s9 = smov %s444_s10 }
 0x1a3   : > { %p9_p5 = scmp.ge.s32.totalorder %s12_s11, 4   ;;  %s514_s10 = smov %s516_s12 }
 0x1a5   :  { %11 = sbr.rel (!%p9_p5) target bundleno = 2 (0x2), region = 61 }

// kernel: token_filter_forward.5
= control target key start
LH: loop header
LB: loop body
LE: loop exit
PB: predicated region body
PF: predicated region fallthrough
CT: control target
= control target key end

     0   :  { %s197_s0 = inlined_call_operand.vmem [shape: bf16[16,64], index: 0, kind: input, shape index: {}]   ;;  %s198_s1 = inlined_call_operand.vmem [shape: bf16[64,128], index: 1, kind: input, shape index: {}]   ;;  %s199_s2 = inlined_call_operand.vmem [shape: f32[1,128], index: 2, kind: input, shape index: {}]   ;;  %s200_s3 = inlined_call_operand.hbm [shape: f32[16,128], index: 3, kind: output, shape index: {}]  }
   0x1   :  { %v122_v0 = vld [vmem:[%s198_s1 + $0x18] sm:$0xff]  ;;  %v121_v1 = vld [vmem:[%s198_s1 + $0x10] sm:$0xff] }
   0x2   :  { %67 = vmatpush.bf16.msra.mxu0 %v122_v0 }
   0x3   :  { %8 = vsyncpa [#allocation3], 0  ;;  %v120_v2 = vld [vmem:[%s198_s1 + $0x8] sm:$0xff]  ;;  %v119_v3 = vld [vmem:[%s198_s1] sm:$0xff]  ;;  %vm59_vm0 = vcmask 523264   ;;  %s153_s24 = smov [#allocation2]  }
   0x4   :  { %v118_v4 = vld [vmem:[%s197_s0] sm:$0xff]  ;;  %s83_s25 = sshll.u32 %s153_s24, 4  ;;  %s85_s1 = sshll.u32 %s200_s3, 4  ;;  %s84_s25 = int_to_ptr.vmem [resolvable:$true] %s83_s25  ;;  %s86_s1 = int_to_ptr.hbm [resolvable:$true] %s85_s1 }
   0x5   :  { %v126_v5 = vld [vmem:[%s199_s2] ss:$0 sm:$0xff]  ;;  %s154_s0 = smov 128   ;;  %s155_s28 = smov 8  }
   0x6   :  { %68 = vmatpush.bf16.msra.mxu0 %v121_v1 }
   0xa   :  { %69 = vmatpush.bf16.msra.mxu0 %v120_v2 }
   0xe   :  { %70 = vmatpush.bf16.msra.mxu0 %v119_v3 }
  0x11   :  { %117 = vmatmul.msk.bf16.vlgmr.msra.gmra.mxu0 %vm59_vm0, %v118_v4 }
  0x8e   :  { %v72_v6 = vpop.f32.mrf.mxu0 }
  0x8f   :  { %v73_v7 = vadd.f32 %v126_v5, %v72_v6 }
  0x91   :  { %77 = vst [vmem:[#allocation2] sm:$0xff] %v73_v7 }
  0x96   :  { %v74_v8 = vpop.f32.mrf.mxu0 }
  0x97   :  { %v75_v9 = vadd.f32 %v126_v5, %v74_v8 }
  0x99   :  { %78 = vst [vmem:[#allocation2 + $0x8] sm:$0xff] %v75_v9 }
  0x9a   :  { %91 = dma.vmem_to_hbm [thread:$0]  %s84_s25, 256, %s86_s1, [#allocation3], %s154_s0, %s154_s0, %s155_s28  }
  0x9b   :  { %151 = dma.done.wait [#allocation3], 256  }
  0x9c   :  { %152 = vsyncadd [#allocation3], 4294967040 }
  0x9d   :  { %96 = vsyncpa [#allocation3], 1 }

// kernel: token_filter_forward.4
= control target key start
LH: loop header
LB: loop body
LE: loop exit
PB: predicated region body
PF: predicated region fallthrough
CT: control target
= control target key end

     0   :  { %s1836_s13 = smov 0   ;;  %s2216_s0 = inlined_call_operand.vmem [shape: bf16[2,8,64], index: 0, kind: input, shape index: {}]   ;;  %s2217_s1 = inlined_call_operand.vmem [shape: bf16[2,16,64], index: 1, kind: input, shape index: {}]   ;;  %s2218_s2 = inlined_call_operand.vmem [shape: bf16[64,64], index: 2, kind: input, shape index: {}]   ;;  %s2219_s3 = inlined_call_operand.vmem [shape: f32[1,64], index: 3, kind: input, shape index: {}]   ;;  %s2220_s4 = inlined_call_operand.vmem [shape: bf16[64,64], index: 4, kind: input, shape index: {}]   ;;  %s2221_s5 = inlined_call_operand.vmem [shape: f32[1,64], index: 5, kind: input, shape index: {}]   ;;  %s2222_s6 = inlined_call_operand.vmem [shape: bf16[64,64], index: 6, kind: input, shape index: {}]   ;;  %s2223_s7 = inlined_call_operand.vmem [shape: f32[1,64], index: 7, kind: input, shape index: {}]   ;;  %s2224_s8 = inlined_call_operand.vmem [shape: bf16[64,64], index: 8, kind: input, shape index: {}]   ;;  %s2225_s9 = inlined_call_operand.vmem [shape: f32[1,64], index: 9, kind: input, shape index: {}]   ;;  %s2226_s10 = inlined_call_operand.vmem [shape: bf16[2,8,64], index: 10, kind: output, shape index: {}]  }
   0x1 LB: > { %s1619_s14 = sadd.s32 4294967295, %s1771_s13   ;;  %p1623_p0 = scmp.ge.s32.totalorder %s1771_s13, 1  ;;  %s1771_s13 = sphi %s1836_s13, %s20_s13  }
   0x2   : > { %p321_p1 = scmp.lt.s32.totalorder %s1771_s13, 3 }
   0x4   : > { %p322_p2 = pnand %p1623_p0, %p321_p1 }
   0x5   : > { %p362_p3 = scmp.lt.s32.totalorder (!%p322_p2), %s1619_s14, 1  ;;  %s1773_s11 = smov (!%p322_p2), 80  }
   0x6   : > { %325 = sbr.rel (%p322_p2) target bundleno = 1143 (0x477), region = 60  ;;  %s1774_s12 = smov (!%p322_p2), 96  }
   0x7   : > { %s1775_s15 = smov (!%p322_p2), 112   ;;  %s1779_s22 = smov (!%p322_p2), 32  }
   0x8   : > { %s1780_s23 = smov (!%p322_p2), 16  }
   0xb   : > { %v1719_v0 = vld [vmem:[%s2220_s4 + $0x18] sm:$0xff]  ;;  %v1718_v2 = vld [vmem:[%s2220_s4 + $0x10] sm:$0xff]  ;;  %s2228_s14 = smov (!%p362_p3, %s1619_s14), 1  ;;  %v1717_v6 = vld [vmem:[%s2220_s4 + $0x8] sm:$0xff]  ;;  %vm415_vm0 = vcmask 523264   ;;  %vm575_vm1 = vcmask 1047556  }
   0xc   : > { %v1715_v1 = vld [vmem:[%s2218_s2 + $0x18] sm:$0xff]  ;;  %481 = vmatpush.bf16.msra.mxu1 %v1719_v0  ;;  %v1714_v4 = vld [vmem:[%s2218_s2 + $0x10] sm:$0xff]  ;;  %s1710_s29 = sshll.u32 %s2228_s14, 3  ;;  %v1713_v7 = vld [vmem:[%s2218_s2 + $0x8] sm:$0xff]  ;;  %s1624_s16 = sshll.u32 %s2228_s14, 2  ;;  %vm1154_vm2 = vcmask 130048  }
   0xd   : > { %v1723_v3 = vld [vmem:[%s2222_s6 + $0x18] sm:$0xff]  ;;  %423 = vmatpush.bf16.msra.mxu0 %v1715_v1  ;;  %v1722_v5 = vld [vmem:[%s2222_s6 + $0x10] sm:$0xff]  ;;  %v1721_v8 = vld [vmem:[%s2222_s6 + $0x8] sm:$0xff]  ;;  %s370_s21 = scalar_lea.vmem %s2217_s1, %s1710_s29  ;;  %s1889_s26 = scalar_lea.vmem %s2216_s0, %s1624_s16  ;;  %v1776_v30 = vmov 1983009808   ;;  %vm1492_vm3 = vcmask 261120  }
   0xe   : > { %533 = vmatpush.bf16.msra.mxu2 %v1723_v3  ;;  %v1716_v9 = vld [vmem:[%s2220_s4] sm:$0xff]  ;;  %v566_v31 = vunpack.c.l.s4 %v1776_v30  ;;  %v1777_v38 = vmov 1934713408   ;;  %vm1494_vm4 = vcmask 392192   ;;  %s374_s20 = scalar_lea.vmem %s2226_s10, %s1624_s16  ;;  %vm1552_vm5 = vcmask 519168  }
   0xf   : > { %v1712_v10 = vld [vmem:[%s2218_s2] sm:$0xff]  ;;  %v580_v39 = vunpack.c.l.s4 %v1777_v38 }
  0x10   : > { %482 = vmatpush.bf16.msra.mxu1 %v1718_v2  ;;  %v1720_v11 = vld [vmem:[%s2222_s6] sm:$0xff]  ;;  %v1927_v36 = vunpack.c.0.s8 %v566_v31 }
  0x11   : > { %424 = vmatpush.bf16.msra.mxu0 %v1714_v4  ;;  %v1711_v12 = vld [vmem:[%s370_s21] sm:$0xff]  ;;  %v1932_v50 = vunpack.c.0.s8 %v580_v39  ;;  %s1778_s21 = smov 48  }
  0x12   : > { %534 = vmatpush.bf16.msra.mxu2 %v1722_v5  ;;  %v376_v13 = vld [vmem:[%s1889_s26] sm:$0xf] }
  0x13   : > { %v1744_v14 = vld [vmem:[%s2221_s5] ss:$0 sm:$0xff] }
  0x14   : > { %483 = vmatpush.bf16.msra.mxu1 %v1717_v6  ;;  %v1745_v21 = vld [vmem:[%s2219_s3] ss:$0 sm:$0xff] }
  0x15   : > { %425 = vmatpush.bf16.msra.mxu0 %v1713_v7  ;;  %v1746_v28 = vld [vmem:[%s2223_s7] ss:$0 sm:$0xff] }
  0x16   : > { %535 = vmatpush.bf16.msra.mxu2 %v1721_v8 }
  0x18   : > { %484 = vmatpush.bf16.msra.mxu1 %v1716_v9 }
  0x19   : > { %426 = vmatpush.bf16.msra.mxu0 %v1712_v10 }
  0x1a   : > { %536 = vmatpush.bf16.msra.mxu2 %v1720_v11 }
  0x1b   : > { %1665 = vmatmul.msk.bf16.vlgmr.msra.gmra.mxu1 %vm415_vm0, %v1711_v12 }
  0x1c   : > { %1644 = vmatmul.msk.bf16.vlgmr.msra.gmra.mxu0 %vm415_vm0, %v376_v13 }
  0x1d   : > { %1682 = vmatmul.msk.bf16.vlgmr.msra.gmra.mxu2 %vm415_vm0, %v1711_v12 }
  0x98   : > { %v486_v15 = vpop.f32.mrf.mxu1 }
  0x99   : > { %v487_v16 = vadd.f32 %v1744_v14, %v486_v15  ;;  %v428_v17 = vpop.f32.mrf.mxu0 }
  0x9a   : > { %v429_v24 = vadd.f32 %v1745_v21, %v428_v17 }
  0x9b   : > { %v491_v18 = vpack.c.bf16 %v487_v16, %v487_v16 }
  0x9c   : > { %v1913_v25 = vpack.c.bf16 %v429_v24, %v429_v24 }
  0x9d   : > { %677 = vrot.lane.b32.xlu2 %v491_v18, %s1773_s11  ;;  %673 = vrot.lane.b32.xlu1 %v491_v18, %s1774_s12  ;;  %v684_v45 = vshrl.u32 %v491_v18, 16 }
  0x9e   : > { %669 = vrot.lane.b32.xlu0 %v491_v18, %s1775_s15  ;;  %v555_v59 = vshrl.u32 %v1913_v25, 16 }
  0xa0   : > { %v488_v19 = vpop.f32.mrf.mxu1  ;;  %v538_v26 = vpop.f32.mrf.mxu2 }
  0xa1   : > { %v489_v20 = vadd.f32 %v1744_v14, %v488_v19  ;;  %v430_v22 = vpop.f32.mrf.mxu0  ;;  %v539_v32 = vadd.f32 %v1746_v28, %v538_v26 }
  0xa3   : > { %v1906_v23 = vpack.c.bf16 %v489_v20, %v489_v20  ;;  %v1923_v34 = vpack.c.bf16 %v539_v32, %v539_v32 }
  0xa5   : > { %679 = vrot.lane.b32.xlu2 %v1906_v23, %s1773_s11  ;;  %675 = vrot.lane.b32.xlu1 %v1906_v23, %s1774_s12  ;;  %v696_v16 = vshrl.u32 %v1906_v23, 16 }
  0xa6   : > { %671 = vrot.lane.b32.xlu0 %v1906_v23, %s1775_s15 }
  0xa8   : > { %v540_v29 = vpop.f32.mrf.mxu2 }
  0xa9   : > { %v541_v33 = vadd.f32 %v1746_v28, %v540_v29 }
  0xab   : > { %v1925_v35 = vpack.c.bf16 %v541_v33, %v541_v33 }
  0xad   : > { %548 = vrot.lane.b32.xlu1 %v1913_v25, %s1774_s12  ;;  %550 = vrot.lane.b32.xlu2 %v1913_v25, %s1773_s11 }
  0xae   : > { %546 = vrot.lane.b32.xlu0 %v1913_v25, %s1775_s15 }
  0xb5   : > { %913 = vrot.lane.b32.xlu1 %v1925_v35, %s1775_s15 }
  0xb6   : > { %911 = vrot.lane.b32.xlu0 %v1923_v34, %s1775_s15 }
  0xbe   : > { %917 = vrot.lane.b32.xlu0 %v1925_v35, %s1774_s12 }
  0xf7   : > { %v678_v27 = vpop.permute.xlu2 %677 }
  0xf8   : > { %v691_v40 = vshrl.u32 %v678_v27, 16 }
  0xff   : > { %v680_v47 = vpop.permute.xlu2 %679 }
 0x100   : > { %v703_v60 = vshrl.u32 %v680_v47, 16 }
 0x107   : > { %v551_v10 = vpop.permute.xlu2 %550 }
 0x108   : > { %v562_v24 = vshrl.u32 %v551_v10, 16 }
 0x10f   : > { %v674_v37 = vpop.permute.xlu1 %673 }
 0x110   : > { %v689_v41 = vpack.i.b16 %v678_v27, %v674_v37  ;;  %v690_v42 = vshrl.u32 %v674_v37, 16  ;;  %v670_v43 = vpop.permute.xlu0 %669 }
 0x111   : > { %v683_v44 = vpack.i.b16 %v670_v43, %v491_v18  ;;  %v685_v46 = vshrl.u32 %v670_v43, 16 }
 0x112   : > { %v692_v48 = vpack.i.b16 %v691_v40, %v690_v42  ;;  %v714_v49 = vperm.slane %v689_v41, %v1927_v36 }
 0x113   : > { %v686_v51 = vpack.i.b16 %v685_v46, %v684_v45  ;;  %v709_v52 = vperm.slane %v683_v44, %v1927_v36 }
 0x114   : > { %v715_v53 = vrot.slane %v714_v49, 4  ;;  %v740_v54 = vperm.slane %v692_v48, %v1927_v36 }
 0x115   : > { %v717_v55 = vrot.slane %v709_v52, 4  ;;  %v735_v56 = vperm.slane %v686_v51, %v1927_v36 }
 0x116   : > { %v741_v57 = vrot.slane %v740_v54, 4  ;;  %v716_v58 = vsel %vm575_vm1, %v715_v53, %v709_v52 }
 0x117   : > { %v718_v61 = vsel %vm575_vm1, %v714_v49, %v717_v55  ;;  %v722_v62 = vperm.slane %v716_v58, %v1932_v50  ;;  %v743_v63 = vrot.slane %v735_v56, 4  ;;  %v676_v0 = vpop.permute.xlu1 %675 }
 0x118   : > { %v726_v1 = vperm.slane %v718_v61, %v1932_v50  ;;  %v742_v2 = vsel %vm575_vm1, %v741_v57, %v735_v56  ;;  %v701_v3 = vpack.i.b16 %v680_v47, %v676_v0  ;;  %v702_v4 = vshrl.u32 %v676_v0, 16  ;;  %v672_v5 = vpop.permute.xlu0 %671 }
 0x119   : > { %v727_v6 = vrot.slane %v722_v62, 4  ;;  %v744_v7 = vsel %vm575_vm1, %v740_v54, %v743_v63  ;;  %v1947_v8 = vperm.slane %v742_v2, %v1932_v50  ;;  %v695_v9 = vpack.i.b16 %v672_v5, %v1906_v23 }
 0x11a   : > { %v729_v11 = vrot.slane %v726_v1, 4  ;;  %v752_v12 = vperm.slane %v744_v7, %v1932_v50  ;;  %v704_v13 = vpack.i.b16 %v703_v60, %v702_v4  ;;  %v766_v14 = vperm.slane %v701_v3, %v1927_v36 }
 0x11b   : > { %v753_v15 = vrot.slane %v1947_v8, 4  ;;  %v697_v17 = vshrl.u32 %v672_v5, 16  ;;  %v761_v18 = vperm.slane %v695_v9, %v1927_v36  ;;  %v728_v26 = vsel %vm575_vm1, 0, %v727_v6 }
 0x11c   : > { %v730_v19 = vsel %vm575_vm1, 0, %v729_v11  ;;  %v755_v20 = vrot.slane %v752_v12, 4  ;;  %v1957_v21 = vsel %vm575_vm1, %v729_v11, %v722_v62  ;;  %v767_v22 = vrot.slane %v766_v14, 4 }
 0x11d   : > { %v792_v27 = vperm.slane %v704_v13, %v1927_v36  ;;  %v698_v28 = vpack.i.b16 %v697_v17, %v696_v16  ;;  %v754_v29 = vsel %vm575_vm1, 0, %v753_v15  ;;  %v814_v30 = vrot.slane %v730_v19, 4 }
 0x11e   : > { %v768_v23 = vsel %vm575_vm1, %v767_v22, %v761_v18  ;;  %v769_v31 = vrot.slane %v761_v18, 4  ;;  %v756_v32 = vsel %vm575_vm1, 0, %v755_v20  ;;  %v813_v39 = vperm.slane %v1957_v21, %v1927_v36 }
 0x11f   : > { %v793_v33 = vrot.slane %v792_v27, 4  ;;  %v774_v37 = vperm.slane %v768_v23, %v1932_v50  ;;  %v549_v38 = vpop.permute.xlu1 %548  ;;  %v787_v41 = vperm.slane %v698_v28, %v1927_v36  ;;  %v815_v54 = vsel %vm575_vm1, %v814_v30, %v728_v26 }
 0x120   : > { %v770_v40 = vsel %vm575_vm1, %v766_v14, %v769_v31  ;;  %v560_v42 = vpack.i.b16 %v551_v10, %v549_v38  ;;  %v561_v43 = vshrl.u32 %v549_v38, 16  ;;  %v547_v44 = vpop.permute.xlu0 %546  ;;  %v833_v62 = vrot.slane %v756_v32, 4 }
 0x121   : > { %v778_v45 = vperm.slane %v770_v40, %v1932_v50  ;;  %v779_v46 = vrot.slane %v774_v37, 4  ;;  %v554_v47 = vpack.i.b16 %v547_v44, %v1913_v25  ;;  %v556_v48 = vshrl.u32 %v547_v44, 16 }
 0x122   : > { %v794_v49 = vsel %vm575_vm1, %v793_v33, %v787_v41  ;;  %v795_v51 = vrot.slane %v787_v41, 4  ;;  %v563_v52 = vpack.i.b16 %v562_v24, %v561_v43  ;;  %v573_v53 = vperm.slane %v560_v42, %v1927_v36 }
 0x123   : > { %v781_v55 = vrot.slane %v778_v45, 4  ;;  %v800_v56 = vperm.slane %v794_v49, %v1932_v50  ;;  %v557_v57 = vpack.i.b16 %v556_v48, %v555_v59  ;;  %v568_v25 = vperm.slane %v554_v47, %v1927_v36 }
 0x124   : > { %v796_v58 = vsel %vm575_vm1, %v792_v27, %v795_v51  ;;  %v574_v60 = vrot.slane %v573_v53, 4  ;;  %v600_v61 = vperm.slane %v563_v52, %v1927_v36  ;;  %v780_v2 = vsel %vm575_vm1, 0, %v779_v46 }
 0x125   : > { %v782_v63 = vsel %vm575_vm1, 0, %v781_v55  ;;  %v804_v0 = vperm.slane %v796_v58, %v1932_v50  ;;  %v805_v1 = vrot.slane %v800_v56, 4  ;;  %v577_v5 = vrot.slane %v568_v25, 4 }
 0x126   : > { %v601_v3 = vrot.slane %v600_v61, 4  ;;  %v576_v4 = vsel %vm575_vm1, %v574_v60, %v568_v25  ;;  %v852_v6 = vrot.slane %v782_v63, 4  ;;  %v595_v9 = vperm.slane %v557_v57, %v1927_v36 }
 0x127   : > { %v807_v59 = vrot.slane %v804_v0, 4  ;;  %v582_v7 = vperm.slane %v576_v4, %v1932_v50  ;;  %v806_v10 = vsel %vm575_vm1, 0, %v805_v1  ;;  %v847_v11 = vsel %vm575_vm1, %v781_v55, %v774_v37 }
 0x128   : > { %v578_v12 = vsel %vm575_vm1, %v573_v53, %v577_v5  ;;  %v819_v13 = vperm.slane %v815_v54, %v1927_v36  ;;  %v602_v17 = vsel %vm575_vm1, %v601_v3, %v595_v9  ;;  %v603_v18 = vrot.slane %v595_v9, 4 }
 0x129   : > { %v808_v14 = vsel %vm575_vm1, 0, %v807_v59  ;;  %v586_v15 = vperm.slane %v578_v12, %v1932_v50  ;;  %v587_v16 = vrot.slane %v582_v7, 4  ;;  %v1992_v19 = vperm.slane %v602_v17, %v1932_v50 }
 0x12a   : > { %v820_v21 = vrot.slane %v819_v13, 4  ;;  %v828_v22 = vsel %vm575_vm1, %v755_v20, %v1947_v8  ;;  %v853_v24 = vsel %vm575_vm1, %v852_v6, %v780_v2  ;;  %v871_v26 = vrot.slane %v808_v14, 4 }
 0x12b   : > { %v589_v27 = vrot.slane %v586_v15, 4  ;;  %v834_v28 = vsel %vm575_vm1, %v833_v62, %v754_v29  ;;  %v604_v30 = vsel %vm575_vm1, %v600_v61, %v603_v18  ;;  %v613_v23 = vrot.slane %v1992_v19, 4 }
 0x12c   : > { %v821_v31 = vsel %vm575_vm1, %v820_v21, %v813_v39  ;;  %v838_v32 = vperm.slane %v834_v28, %v1927_v36  ;;  %v588_v33 = vsel %vm575_vm1, 0, %v587_v16  ;;  %v612_v8 = vperm.slane %v604_v30, %v1932_v50 }
 0x12d   : > { %v590_v37 = vsel %vm575_vm1, 0, %v589_v27  ;;  %v832_v20 = vperm.slane %v828_v22, %v1927_v36  ;;  %v614_v38 = vsel %vm575_vm1, 0, %v613_v23  ;;  %v617_v29 = vsel %vm575_vm1, %v589_v27, %v582_v7 }
 0x12e   : > { %v825_v40 = vperm.slane %v821_v31, %v1932_v50  ;;  %v839_v41 = vrot.slane %v838_v32, 4  ;;  %v615_v42 = vrot.slane %v612_v8, 4  ;;  %v857_v39 = vperm.slane %v853_v24, %v1927_v36 }
 0x12f   : > { %v866_v43 = vsel %vm575_vm1, %v807_v59, %v800_v56  ;;  %v872_v44 = vsel %vm575_vm1, %v871_v26, %v806_v10  ;;  %v622_v45 = vrot.slane %v590_v37, 4  ;;  %v851_v47 = vperm.slane %v847_v11, %v1927_v36 }
 0x130   : > { %v840_v46 = vsel %vm575_vm1, %v839_v41, %v832_v20  ;;  %v876_v48 = vperm.slane %v872_v44, %v1927_v36  ;;  %v616_v49 = vsel %vm575_vm1, 0, %v615_v42  ;;  %v858_v52 = vrot.slane %v857_v39, 4 }
 0x131   : > { %v844_v51 = vperm.slane %v840_v46, %v1932_v50  ;;  %v870_v53 = vperm.slane %v866_v43, %v1927_v36  ;;  %v888_v55 = vshrl.u32 %v825_v40, 16  ;;  %v826_v56 = vrot.slane %v825_v40, 4 }
 0x132   : > { %v877_v54 = vrot.slane %v876_v48, 4  ;;  %v859_v57 = vsel %vm575_vm1, %v858_v52, %v851_v47  ;;  %v641_v25 = vrot.slane %v616_v49, 4  ;;  %v621_v0 = vperm.slane %v617_v29, %v1927_v36 }
 0x133   : > { %v887_v58 = vpack.i.b16 %v844_v51, %v825_v40  ;;  %v889_v60 = vshrl.u32 %v844_v51, 16  ;;  %v845_v61 = vrot.slane %v844_v51, 4  ;;  %v863_v62 = vperm.slane %v859_v57, %v1932_v50 }
 0x134   : > { %v878_v63 = vsel %vm575_vm1, %v877_v54, %v870_v53  ;;  %v827_v2 = vsel %vm575_vm1, 0, %v826_v56  ;;  %v623_v4 = vsel %vm575_vm1, %v622_v45, %v588_v33  ;;  %v642_v32 = vsel %vm575_vm1, %v641_v25, %v614_v38 }
 0x135   : > { %v882_v1 = vperm.slane %v878_v63, %v1932_v50  ;;  %v846_v3 = vsel %vm575_vm1, 0, %v845_v61  ;;  %v1151_v5 = vunpack.c.l.b16 %v887_v58  ;;  %v890_v59 = vpack.i.b16 %v889_v60, %v888_v55 }
 0x136   : > { %v900_v6 = vshrl.u32 %v863_v62, 16  ;;  %v864_v7 = vrot.slane %v863_v62, 4  ;;  %v893_v12 = vpack.i.b16 %v846_v3, %v827_v2  ;;  %v894_v14 = vshrl.u32 %v827_v2, 16 }
 0x137   : > { %v899_v9 = vpack.i.b16 %v882_v1, %v863_v62  ;;  %v901_v10 = vshrl.u32 %v882_v1, 16  ;;  %v883_v11 = vrot.slane %v882_v1, 4  ;;  %v895_v15 = vshrl.u32 %v846_v3, 16 }
 0x138   : > { %v865_v13 = vsel %vm575_vm1, 0, %v864_v7  ;;  %v627_v16 = vperm.slane %v623_v4, %v1927_v36  ;;  %v1174_v23 = vunpack.c.l.b16 %v890_v59  ;;  %v1196_v33 = vunpack.c.l.b16 %v893_v12 }
 0x139   : > { %v1152_v17 = vunpack.c.l.b16 %v899_v9  ;;  %v902_v18 = vpack.i.b16 %v901_v10, %v900_v6  ;;  %v884_v21 = vsel %vm575_vm1, 0, %v883_v11  ;;  %v906_v22 = vshrl.u32 %v865_v13, 16 }
 0x13a   : > { %v905_v24 = vpack.i.b16 %v884_v21, %v865_v13  ;;  %v896_v26 = vpack.i.b16 %v895_v15, %v894_v14  ;;  %v907_v27 = vshrl.u32 %v884_v21, 16  ;;  %v628_v28 = vrot.slane %v627_v16, 4  ;;  %v2058_v13 = vpop.permute.xlu0 %911 }
 0x13b   : > { %v1153_v30 = vpack.c.b16 %v1152_v17, %v1151_v5  ;;  %v1175_v31 = vunpack.c.l.b16 %v902_v18  ;;  %v636_v39 = vsel %vm575_vm1, %v615_v42, %v1992_v19  ;;  %v646_v46 = vperm.slane %v642_v32, %v1927_v36 }
 0x13c   : > { %v1197_v37 = vunpack.c.l.b16 %v905_v24  ;;  %v908_v8 = vpack.i.b16 %v907_v27, %v906_v22  ;;  %v629_v20 = vsel %vm575_vm1, %v628_v28, %v621_v0  ;;  %v1218_v44 = vunpack.c.l.b16 %v896_v26  ;;  %v914_v28 = vpop.permute.xlu1 %913 }
 0x13d   : > { %v1159_v29 = vsel %vm1154_vm2, %v1153_v30, 0  ;;  %v1176_v40 = vpack.c.b16 %v1175_v31, %v1174_v23  ;;  %v633_v41 = vperm.slane %v629_v20, %v1932_v50  ;;  %v640_v49 = vperm.slane %v636_v39, %v1927_v36 }
 0x13e   : > { %1168 = vmatpush.bf16.xpose.msra.mxu3 %v1159_v29  ;;  %v1198_v43 = vpack.c.b16 %v1197_v37, %v1196_v33  ;;  %v1219_v45 = vunpack.c.l.b16 %v908_v8  ;;  %v647_v51 = vrot.slane %v646_v46, 4  ;;  %v938_v32 = vshrl.u32 %v1925_v35, 16 }
 0x13f   : > { %v1181_v38 = vsel %vm1154_vm2, %v1176_v40, 0  ;;  %v634_v52 = vrot.slane %v633_v41, 4  ;;  %v658_v63 = vshrl.u32 %v633_v41, 16  ;;  %v939_v33 = vshrl.u32 %v914_v28, 16 }
 0x140   : > { %v1203_v47 = vsel %vm1154_vm2, %v1198_v43, 0  ;;  %v1220_v48 = vpack.c.b16 %v1219_v45, %v1218_v44  ;;  %v648_v19 = vsel %vm575_vm1, %v647_v51, %v640_v49  ;;  %v937_v8 = vpack.i.b16 %v914_v28, %v1925_v35 }
 0x141   : > { %1212 = vmatpush.bf16.xpose.msrb.mxu0 %v1203_v47  ;;  %v652_v42 = vperm.slane %v648_v19, %v1932_v50  ;;  %v635_v55 = vsel %vm575_vm1, 0, %v634_v52  ;;  %v940_v20 = vpack.i.b16 %v939_v33, %v938_v32 }
 0x142   : > { %v1225_v53 = vsel %vm1154_vm2, %v1220_v48, 0  ;;  %v664_v60 = vshrl.u32 %v635_v55, 16  ;;  %v918_v14 = vpop.permute.xlu0 %917  ;;  %v1003_v39 = vperm.slane %v937_v8, %v1927_v36 }
 0x143   : > { %1234 = vmatpush.bf16.xpose.msrb.mxu1 %v1225_v53  ;;  %v657_v54 = vpack.i.b16 %v652_v42, %v633_v41  ;;  %v653_v56 = vrot.slane %v652_v42, 4  ;;  %v659_v62 = vshrl.u32 %v652_v42, 16  ;;  %v1029_v43 = vperm.slane %v940_v20, %v1927_v36 }
 0x144   : > { %v944_v46 = vshrl.u32 %v918_v14, 16 }
 0x145   : > { %1683 = vmatmul.msk.bf16.vlgmr.msra.gmra.mxu3 %vm1154_vm2, %v657_v54  ;;  %v654_v57 = vsel %vm575_vm1, 0, %v653_v56  ;;  %v660_v0 = vpack.i.b16 %v659_v62, %v658_v63  ;;  %v1037_v52 = vrot.slane %v1029_v43, 4 }
 0x146   : > { %1190 = vmatpush.bf16.xpose.msrb.mxu3 %v1181_v38  ;;  %v663_v58 = vpack.i.b16 %v654_v57, %v635_v55  ;;  %v665_v61 = vshrl.u32 %v654_v57, 16 }
 0x148   : > { %1685 = vmatmul.msk.bf16.vlgmr.msrb.gmra.mxu0 %vm1154_vm2, %v663_v58  ;;  %v666_v25 = vpack.i.b16 %v665_v61, %v664_v60 }
 0x14a   : > { %1686 = vmatmul.msk.bf16.vlgmr.msrb.gmra.mxu1 %vm1154_vm2, %v666_v25 }
 0x155   : > { %1684 = vmatmul.msk.bf16.vlgmr.msrb.gmra.mxu3 %vm1154_vm2, %v660_v0 }
 0x1c5   : > { %v1214_v1 = vpop.f32.mrf.mxu0 }
 0x1c6   : > { %v1246_v2 = vsel %vm1154_vm2, %v1214_v1, -inf }
 0x1c7   : > { %v1236_v3 = vpop.f32.mrf.mxu1  ;;  %1247 = vmax.xlane.f32.xlu2 %v1246_v2 }
 0x1c8   : > { %v1170_v4 = vpop.f32.mrf.mxu3  ;;  %v1249_v6 = vsel %vm1154_vm2, %v1236_v3, -inf }
 0x1c9   : > { %v1240_v5 = vsel %vm1154_vm2, %v1170_v4, -inf }
 0x1ca   : > { %1241 = vmax.xlane.f32.xlu0 %v1240_v5 }
 0x1cd   : > { %v1216_v59 = vpop.f32.mrf.mxu0 }
 0x1ce   : > { %v926_v59 = vshrl.u32 %v1923_v34, 16 }
 0x1cf   : > { %v1238_v7 = vpop.f32.mrf.mxu1  ;;  %1250 = vmax.xlane.f32.xlu2 %v1249_v6  ;;  %v927_v6 = vshrl.u32 %v2058_v13, 16 }
 0x1d0   : > { %v1172_v9 = vpop.f32.mrf.mxu3 }
 0x1d8   : > { %v1192_v10 = vpop.f32.mrf.mxu3 }
 0x1d9   : > { %v1243_v11 = vsel %vm1154_vm2, %v1192_v10, -inf }
 0x1da   : > { %1244 = vmax.xlane.f32.xlu1 %v1243_v11  ;;  %v925_v11 = vpack.i.b16 %v2058_v13, %v1923_v34 }
 0x1de   : > { %921 = vrot.lane.b32.xlu0 %v1925_v35, %s1773_s11  ;;  %v1011_v35 = vrot.slane %v1003_v39, 4 }
 0x1e0   : > { %v1194_v12 = vpop.f32.mrf.mxu3 }
 0x1e7   : > { %915 = vrot.lane.b32.xlu2 %v1923_v34, %s1774_s12 }
 0x1f3   : > { %919 = vrot.lane.b32.xlu1 %v1923_v34, %s1773_s11 }
 0x23a   : > { %v1248_v15 = vpop.xlane.xlu2 %1247 }
 0x23b   : > { %v1254_v16 = vsub.f32 %v1214_v1, %v1248_v15 }
 0x23d   : > { %v1260_v17 = vmul.f32 1.442695, %v1254_v16  ;;  %v1242_v18 = vpop.xlane.xlu0 %1241 }
 0x23e   : > { %v1252_v21 = vsub.f32 %v1170_v4, %v1242_v18  ;;  %v951_v18 = vperm.slane %v925_v11, %v1927_v36 }
 0x23f   : > { %1748 = vpow2.f32 %v1260_v17 }
 0x240   : > { %v1256_v22 = vmul.f32 1.442695, %v1252_v21  ;;  %v959_v13 = vrot.slane %v951_v18, 4 }
 0x242   : > { %1750 = vpow2.f32 %v1256_v22  ;;  %v1251_v24 = vpop.xlane.xlu2 %1250 }
 0x243   : > { %v1255_v26 = vsub.f32 %v1236_v3, %v1251_v24 }
 0x245   : > { %v2060_v27 = vpop.eup %1748  ;;  %v1262_v30 = vmul.f32 1.442695, %v1255_v26 }
 0x246   : > { %v1270_v23 = vsel %vm1154_vm2, %v2060_v27, 0.0 }
 0x247   : > { %1271 = vadd.xlane.f32.xlu0 %v1270_v23  ;;  %1752 = vpow2.f32 %v1262_v30 }
 0x248   : > { %v2064_v31 = vpop.eup %1750 }
 0x249   : > { %v1264_v37 = vsel %vm1154_vm2, %v2064_v31, 0.0 }
 0x24a   : > { %1265 = vadd.xlane.f32.xlu2 %v1264_v37  ;;  %v916_v16 = vpop.permute.xlu2 %915 }
 0x24b   : > { %v932_v26 = vshrl.u32 %v916_v16, 16 }
 0x24d   : > { %v1245_v29 = vpop.xlane.xlu1 %1244  ;;  %v2070_v40 = vpop.eup %1752 }
 0x24e   : > { %v1253_v41 = vsub.f32 %v1192_v10, %v1245_v29  ;;  %v1273_v48 = vsel %vm1154_vm2, %v2070_v40, 0.0 }
 0x250   : > { %v1258_v44 = vmul.f32 1.442695, %v1253_v41  ;;  %v922_v45 = vpop.permute.xlu0 %921 }
 0x251   : > { %v943_v38 = vpack.i.b16 %v922_v45, %v918_v14  ;;  %v945_v47 = vshrl.u32 %v922_v45, 16  ;;  %v928_v14 = vpack.i.b16 %v927_v6, %v926_v59 }
 0x252   : > { %1754 = vpow2.f32 %v1258_v44  ;;  %1274 = vadd.xlane.f32.xlu2 %v1273_v48 }
 0x253   : > { %v946_v49 = vpack.i.b16 %v945_v47, %v944_v46  ;;  %v1008_v51 = vperm.slane %v943_v38, %v1927_v36  ;;  %v977_v21 = vperm.slane %v928_v14, %v1927_v36 }
 0x255   : > { %v1009_v53 = vrot.slane %v1008_v51, 4  ;;  %v1012_v19 = vsel %vm575_vm1, %v1008_v51, %v1011_v35  ;;  %v1034_v42 = vperm.slane %v946_v49, %v1927_v36  ;;  %v985_v37 = vrot.slane %v977_v21, 4 }
 0x256   : > { %v1020_v54 = vperm.slane %v1012_v19, %v1932_v50 }
 0x257   : > { %v1010_v55 = vsel %vm575_vm1, %v1009_v53, %v1003_v39  ;;  %v1035_v56 = vrot.slane %v1034_v42, 4  ;;  %v1038_v57 = vsel %vm575_vm1, %v1034_v42, %v1037_v52 }
 0x258   : > { %v2082_v58 = vpop.eup %1754  ;;  %v1016_v60 = vperm.slane %v1010_v55, %v1932_v50  ;;  %v1023_v61 = vrot.slane %v1020_v54, 4  ;;  %v1046_v25 = vperm.slane %v1038_v57, %v1932_v50 }
 0x259   : > { %v1036_v62 = vsel %vm575_vm1, %v1035_v56, %v1029_v43  ;;  %v1267_v63 = vsel %vm1154_vm2, %v2082_v58, 0.0 }
 0x25a   : > { %v1042_v0 = vperm.slane %v1036_v62, %v1932_v50  ;;  %v1049_v1 = vrot.slane %v1046_v25, 4  ;;  %1268 = vadd.xlane.f32.xlu1 %v1267_v63  ;;  %v1021_v2 = vrot.slane %v1016_v60, 4  ;;  %v1024_v3 = vsel %vm575_vm1, 0, %v1023_v61 }
 0x25b   : > { %v1094_v10 = vrot.slane %v1024_v3, 4  ;;  %v1089_v8 = vsel %vm575_vm1, %v1023_v61, %v1016_v60 }
 0x25c   : > { %v1047_v4 = vrot.slane %v1042_v0, 4  ;;  %v1050_v5 = vsel %vm575_vm1, 0, %v1049_v1  ;;  %v1022_v12 = vsel %vm575_vm1, 0, %v1021_v2  ;;  %v1108_v33 = vsel %vm575_vm1, %v1049_v1, %v1042_v0 }
 0x25d   : > { %v1113_v7 = vrot.slane %v1050_v5, 4  ;;  %v1095_v17 = vsel %vm575_vm1, %v1094_v10, %v1022_v12  ;;  %v1112_v45 = vperm.slane %v1108_v33, %v1927_v36  ;;  %v1093_v48 = vperm.slane %v1089_v8, %v1927_v36 }
 0x25e   : > { %v1048_v9 = vsel %vm575_vm1, 0, %v1047_v4  ;;  %v1099_v34 = vperm.slane %v1095_v17, %v1927_v36 }
 0x25f   : > { %v1114_v15 = vsel %vm575_vm1, %v1113_v7, %v1048_v9 }
 0x260   : > { %v1118_v24 = vperm.slane %v1114_v15, %v1927_v36  ;;  %v1100_v43 = vrot.slane %v1099_v34, 4 }
 0x262   : > { %v1119_v20 = vrot.slane %v1118_v24, 4  ;;  %v1101_v19 = vsel %vm575_vm1, %v1100_v43, %v1093_v48 }
 0x263   : > { %v1105_v2 = vperm.slane %v1101_v19, %v1932_v50 }
 0x264   : > { %v1120_v52 = vsel %vm575_vm1, %v1119_v20, %v1112_v45 }
 0x265   : > { %v920_v22 = vpop.permute.xlu1 %919  ;;  %v1124_v60 = vperm.slane %v1120_v52, %v1932_v50  ;;  %v1106_v11 = vrot.slane %v1105_v2, 4 }
 0x266   : > { %v931_v28 = vpack.i.b16 %v920_v22, %v916_v16  ;;  %v933_v30 = vshrl.u32 %v920_v22, 16  ;;  %v1142_v22 = vshrl.u32 %v1105_v2, 16 }
 0x267   : > { %v1125_v6 = vrot.slane %v1124_v60, 4  ;;  %v1143_v16 = vshrl.u32 %v1124_v60, 16 }
 0x268   : > { %v934_v23 = vpack.i.b16 %v933_v30, %v932_v26  ;;  %v956_v32 = vperm.slane %v931_v28, %v1927_v36  ;;  %v1141_v26 = vpack.i.b16 %v1124_v60, %v1105_v2  ;;  %v1107_v30 = vsel %vm575_vm1, 0, %v1106_v11 }
 0x26a   : > { %v957_v29 = vrot.slane %v956_v32, 4  ;;  %v960_v41 = vsel %vm575_vm1, %v956_v32, %v959_v13  ;;  %v982_v39 = vperm.slane %v934_v23, %v1927_v36  ;;  %v1144_v13 = vpack.i.b16 %v1143_v16, %v1142_v22 }
 0x26b   : > { %v968_v44 = vperm.slane %v960_v41, %v1932_v50 }
 0x26c   : > { %v958_v46 = vsel %vm575_vm1, %v957_v29, %v951_v18  ;;  %v983_v38 = vrot.slane %v982_v39, 4  ;;  %v986_v47 = vsel %vm575_vm1, %v982_v39, %v985_v37  ;;  %v1126_v18 = vsel %vm575_vm1, 0, %v1125_v6 }
 0x26d   : > { %v964_v35 = vperm.slane %v958_v46, %v1932_v50  ;;  %v971_v49 = vrot.slane %v968_v44, 4  ;;  %v994_v51 = vperm.slane %v986_v47, %v1932_v50  ;;  %v1149_v23 = vshrl.u32 %v1126_v18, 16 }
 0x26e   : > { %v984_v53 = vsel %vm575_vm1, %v983_v38, %v977_v21  ;;  %v1147_v20 = vpack.i.b16 %v1126_v18, %v1107_v30  ;;  %v1148_v29 = vshrl.u32 %v1107_v30, 16  ;;  %v1289_v39 = vunpack.c.l.b16 %v1141_v26 }
 0x26f   : > { %v969_v42 = vrot.slane %v964_v35, 4  ;;  %v972_v54 = vsel %vm575_vm1, 0, %v971_v49  ;;  %v990_v55 = vperm.slane %v984_v53, %v1932_v50  ;;  %v997_v56 = vrot.slane %v994_v51, 4 }
 0x270   : > { %v1056_v57 = vrot.slane %v972_v54, 4  ;;  %v1051_v63 = vsel %vm575_vm1, %v971_v49, %v964_v35  ;;  %v1150_v47 = vpack.i.b16 %v1149_v23, %v1148_v29  ;;  %v1309_v49 = vunpack.c.l.b16 %v1144_v13 }
 0x271   : > { %v970_v61 = vsel %vm575_vm1, 0, %v969_v42  ;;  %v995_v25 = vrot.slane %v990_v55, 4  ;;  %v998_v62 = vsel %vm575_vm1, 0, %v997_v56  ;;  %v1070_v5 = vsel %vm575_vm1, %v997_v56, %v990_v55 }
 0x272   : > { %v1075_v0 = vrot.slane %v998_v62, 4  ;;  %v1057_v1 = vsel %vm575_vm1, %v1056_v57, %v970_v61  ;;  %v1055_v7 = vperm.slane %v1051_v63, %v1927_v36  ;;  %v1074_v14 = vperm.slane %v1070_v5, %v1927_v36 }
 0x273   : > { %v996_v3 = vsel %vm575_vm1, 0, %v995_v25  ;;  %v1061_v4 = vperm.slane %v1057_v1, %v1927_v36  ;;  %v1329_v52 = vunpack.c.l.b16 %v1147_v20  ;;  %v1349_v55 = vunpack.c.l.b16 %v1150_v47 }
 0x274   : > { %v1076_v59 = vsel %vm575_vm1, %v1075_v0, %v996_v3 }
 0x275   : > { %v1062_v9 = vrot.slane %v1061_v4, 4  ;;  %v1080_v10 = vperm.slane %v1076_v59, %v1927_v36 }
 0x277   : > { %v1063_v12 = vsel %vm575_vm1, %v1062_v9, %v1055_v7  ;;  %v1081_v15 = vrot.slane %v1080_v10, 4 }
 0x278   : > { %v1067_v17 = vperm.slane %v1063_v12, %v1932_v50 }
 0x279   : > { %v1082_v21 = vsel %vm575_vm1, %v1081_v15, %v1074_v14 }
 0x27a   : > { %v1086_v24 = vperm.slane %v1082_v21, %v1932_v50  ;;  %v1068_v28 = vrot.slane %v1067_v17, 4  ;;  %v1130_v34 = vshrl.u32 %v1067_v17, 16 }
 0x27c   : > { %v1129_v32 = vpack.i.b16 %v1086_v24, %v1067_v17  ;;  %v1131_v33 = vshrl.u32 %v1086_v24, 16  ;;  %v1069_v37 = vsel %vm575_vm1, 0, %v1068_v28  ;;  %v1087_v8 = vrot.slane %v1086_v24, 4 }
 0x27d   : > { %v1136_v46 = vshrl.u32 %v1069_v37, 16 }
 0x27e   : > { %v1288_v41 = vunpack.c.l.b16 %v1129_v32  ;;  %v1132_v43 = vpack.i.b16 %v1131_v33, %v1130_v34  ;;  %v1088_v44 = vsel %vm575_vm1, 0, %v1087_v8 }
 0x27f   : > { %v1135_v45 = vpack.i.b16 %v1088_v44, %v1069_v37  ;;  %v1137_v38 = vshrl.u32 %v1088_v44, 16 }
 0x280   : > { %v1290_v48 = vpack.c.b16 %v1289_v39, %v1288_v41  ;;  %v1308_v35 = vunpack.c.l.b16 %v1132_v43 }
 0x281   : > { %v1328_v51 = vunpack.c.l.b16 %v1135_v45  ;;  %v1138_v53 = vpack.i.b16 %v1137_v38, %v1136_v46 }
 0x282   : > { %1302 = vmatpush.bf16.msrb.mxu2 %v1290_v48  ;;  %v1310_v19 = vpack.c.b16 %v1309_v49, %v1308_v35 }
 0x283   : > { %v1330_v42 = vpack.c.b16 %v1329_v52, %v1328_v51  ;;  %v1348_v54 = vunpack.c.l.b16 %v1138_v53 }
 0x284   : > { %1322 = vmatpush.bf16.msra.mxu3 %v1310_v19 }
 0x285   : > { %1342 = vmatpush.bf16.msra.mxu0 %v1330_v42  ;;  %v1350_v56 = vpack.c.b16 %v1349_v55, %v1348_v54 }
 0x287   : > { %1362 = vmatpush.bf16.msra.mxu1 %v1350_v56 }
 0x2ba   : > { %v1272_v57 = vpop.xlane.xlu0 %1271 }
 0x2bb   : > { %1756 = vrcp.f32 %v1272_v57 }
 0x2bd   : > { %v1266_v60 = vpop.xlane.xlu2 %1265 }
 0x2be   : > { %1758 = vrcp.f32 %v1266_v60 }
 0x2c1   : > { %v1757_v61 = vpop.eup %1756 }
 0x2c2   : > { %v1282_v25 = vmul.f32 %v1757_v61, %v2060_v27 }
 0x2c4   : > { %v1759_v62 = vpop.eup %1758  ;;  %v1286_v63 = vpack.c.bf16 %v1282_v25, %v1282_v25 }
 0x2c5   : > { %v1280_v0 = vmul.f32 %v1759_v62, %v2064_v31  ;;  %v1275_v1 = vpop.xlane.xlu2 %1274 }
 0x2c6   : > { %1760 = vrcp.f32 %v1275_v1  ;;  %1689 = vmatmul.msk.bf16.vlgmr.msra.gmra.mxu0 %vm1154_vm2, %v1286_v63 }
 0x2c7   : > { %v1284_v2 = vpack.c.bf16 %v1280_v0, %v1280_v0 }
 0x2c9   : > { %1687 = vmatmul.msk.bf16.vlgmr.msrb.gmra.mxu2 %vm1154_vm2, %v1284_v2 }
 0x2cc   : > { %v1761_v3 = vpop.eup %1760 }
 0x2cd   : > { %v1283_v4 = vmul.f32 %v1761_v3, %v2070_v40  ;;  %v1269_v5 = vpop.xlane.xlu1 %1268 }
 0x2ce   : > { %1762 = vrcp.f32 %v1269_v5 }
 0x2cf   : > { %v1287_v59 = vpack.c.bf16 %v1283_v4, %v1283_v4 }
 0x2d1   : > { %1690 = vmatmul.msk.bf16.vlgmr.msra.gmra.mxu1 %vm1154_vm2, %v1287_v59 }
 0x2d4   : > { %v1763_v27 = vpop.eup %1762 }
 0x2d5   : > { %v1281_v6 = vmul.f32 %v1763_v27, %v2082_v58 }
 0x2d7   : > { %v1285_v7 = vpack.c.bf16 %v1281_v6, %v1281_v6 }
 0x2d9   : > { %1688 = vmatmul.msk.bf16.vlgmr.msra.gmra.mxu3 %vm1154_vm2, %v1285_v7 }
 0x343   : > { %v1344_v31 = vpop.f32.mrf.mxu0 }
 0x344   : > { %v1368_v14 = vrot.slane %v1344_v31, 4 }
 0x34b   : > { %v1346_v9 = vpop.f32.mrf.mxu0 }
 0x34c   : > { %v1304_v10 = vpop.f32.mrf.mxu2 }
 0x34d   : > { %v1371_v15 = vrot.slane %v1304_v10, 4  ;;  %v1370_v40 = vsel %vm575_vm1, %v1368_v14, %v1304_v10 }
 0x34e   : > { %v1364_v11 = vpop.f32.mrf.mxu1  ;;  %v1376_v18 = vperm.slane %v1370_v40, %v1927_v36  ;;  %v1725_v40 = vld [vmem:[%s2224_s8 + $0x8] sm:$0xff] }
 0x34f   : > { %v1372_v17 = vsel %vm575_vm1, %v1344_v31, %v1371_v15  ;;  %v1381_v21 = vrot.slane %v1364_v11, 4 }
 0x350   : > { %v1380_v58 = vperm.slane %v1372_v17, %v1927_v36  ;;  %v1395_v28 = vrot.slane %v1376_v18, 4  ;;  %v1724_v17 = vld [vmem:[%s2224_s8] sm:$0xff] }
 0x352   : > { %v1407_v13 = vrot.slane %v1380_v58, 4 }
 0x354   : > { %v1306_v12 = vpop.f32.mrf.mxu2 }
 0x356   : > { %v1366_v16 = vpop.f32.mrf.mxu1 }
 0x357   : > { %v1727_v16 = vld [vmem:[%s2224_s8 + $0x18] sm:$0xff] }
 0x358   : > { %1540 = vmatpush.bf16.msra.mxu2 %v1727_v16 }
 0x35c   : > { %v1324_v22 = vpop.f32.mrf.mxu3 }
 0x35d   : > { %v1382_v24 = vsel %vm575_vm1, %v1381_v21, %v1324_v22  ;;  %v1383_v26 = vrot.slane %v1324_v22, 4 }
 0x35e   : > { %v1388_v30 = vperm.slane %v1382_v24, %v1927_v36 }
 0x35f   : > { %v1384_v34 = vsel %vm575_vm1, %v1364_v11, %v1383_v26 }
 0x360   : > { %v1392_v23 = vperm.slane %v1384_v34, %v1927_v36  ;;  %v1393_v32 = vrot.slane %v1388_v30, 4  ;;  %v1396_v33 = vsel %vm575_vm1, %v1388_v30, %v1395_v28  ;;  %v1747_v30 = vld [vmem:[%s2225_s9] ss:$0 sm:$0xff] }
 0x361   : > { %v1404_v37 = vperm.slane %v1396_v33, %v1932_v50  ;;  %v1764_v34 = vld [vmem:[%s1889_s26] sm:$0xf] }
 0x362   : > { %v1394_v8 = vsel %vm575_vm1, %v1393_v32, %v1376_v18  ;;  %v1405_v20 = vrot.slane %v1392_v23, 4  ;;  %v1408_v29 = vsel %vm575_vm1, %v1392_v23, %v1407_v13  ;;  %v1549_v13 = vunpack.c.l.bf16 %v1764_v34 }
 0x363   : > { %v1400_v41 = vperm.slane %v1394_v8, %v1932_v50  ;;  %v1416_v39 = vperm.slane %v1408_v29, %v1932_v50  ;;  %v1419_v43 = vrot.slane %v1404_v37, 4 }
 0x364   : > { %v1406_v44 = vsel %vm575_vm1, %v1405_v20, %v1380_v58  ;;  %v1326_v45 = vpop.f32.mrf.mxu3 }
 0x365   : > { %v1412_v46 = vperm.slane %v1406_v44, %v1932_v50  ;;  %v1417_v38 = vrot.slane %v1400_v41, 4  ;;  %v1420_v47 = vsel %vm575_vm1, 0.0, %v1419_v43  ;;  %v1423_v48 = vrot.slane %v1416_v39, 4 }
 0x366   : > { %v1425_v35 = vsel %vm575_vm1, %v1419_v43, %v1400_v41  ;;  %v1430_v49 = vrot.slane %v1420_v47, 4 }
 0x367   : > { %v1418_v51 = vsel %vm575_vm1, 0.0, %v1417_v38  ;;  %v1421_v52 = vrot.slane %v1412_v46, 4  ;;  %v1424_v53 = vsel %vm575_vm1, 0.0, %v1423_v48  ;;  %v1429_v19 = vperm.slane %v1425_v35, %v1927_v36 }
 0x368   : > { %v1441_v42 = vrot.slane %v1424_v53, 4  ;;  %v1431_v54 = vsel %vm575_vm1, %v1430_v49, %v1418_v51  ;;  %v1436_v55 = vsel %vm575_vm1, %v1423_v48, %v1412_v46 }
 0x369   : > { %v1422_v56 = vsel %vm575_vm1, 0.0, %v1421_v52  ;;  %v1435_v57 = vperm.slane %v1431_v54, %v1927_v36  ;;  %v1440_v60 = vperm.slane %v1436_v55, %v1927_v36  ;;  %v1449_v61 = vrot.slane %v1429_v19, 4 }
 0x36a   : > { %v1442_v25 = vsel %vm575_vm1, %v1441_v42, %v1422_v56 }
 0x36b   : > { %v1446_v62 = vperm.slane %v1442_v25, %v1927_v36  ;;  %v1450_v63 = vsel %vm575_vm1, %v1435_v57, %v1449_v61  ;;  %v1461_v0 = vrot.slane %v1440_v60, 4  ;;  %v1447_v1 = vrot.slane %v1435_v57, 4 }
 0x36c   : > { %v1458_v2 = vperm.slane %v1450_v63, %v1932_v50 }
 0x36d   : > { %v1462_v3 = vsel %vm575_vm1, %v1446_v62, %v1461_v0  ;;  %v1448_v4 = vsel %vm575_vm1, %v1447_v1, %v1429_v19  ;;  %v1459_v5 = vrot.slane %v1446_v62, 4 }
 0x36e   : > { %v1470_v59 = vperm.slane %v1462_v3, %v1932_v50  ;;  %v1477_v27 = vrot.slane %v1458_v2, 4  ;;  %v1454_v6 = vperm.slane %v1448_v4, %v1932_v50 }
 0x36f   : > { %v1460_v7 = vsel %vm575_vm1, %v1459_v5, %v1440_v60 }
 0x370   : > { %v1478_v36 = vsel %vm575_vm1, %v1470_v59, %v1477_v27  ;;  %v1475_v31 = vrot.slane %v1470_v59, 4  ;;  %v1466_v9 = vperm.slane %v1460_v7, %v1932_v50  ;;  %v1473_v10 = vrot.slane %v1454_v6, 4  ;;  %v1726_v50 = vld [vmem:[%s2224_s8 + $0x10] sm:$0xff] }
 0x371   : > { %1488 = vrot.lane.b32.xlu2 %v1478_v36, %s1778_s21  ;;  %1541 = vmatpush.bf16.msra.mxu2 %v1726_v50 }
 0x372   : > { %v1476_v11 = vsel %vm575_vm1, %v1475_v31, %v1458_v2  ;;  %v1471_v12 = vrot.slane %v1466_v9, 4  ;;  %v1474_v14 = vsel %vm575_vm1, %v1466_v9, %v1473_v10 }
 0x373   : > { %1484 = vrot.lane.b32.xlu0 %v1476_v11, %s1779_s22  ;;  %1480 = vrot.lane.b32.xlu1 %v1474_v14, %s1780_s23 }
 0x374   : > { %v1472_v15 = vsel %vm575_vm1, %v1471_v12, %v1454_v6 }
 0x375   : > { %1542 = vmatpush.bf16.msra.mxu2 %v1725_v40 }
 0x379   : > { %1543 = vmatpush.bf16.msra.mxu2 %v1724_v17 }
 0x3cb   : > { %v1489_v22 = vpop.permute.xlu2 %1488 }
 0x3e5   : > { %v1485_v18 = vpop.permute.xlu0 %1484  ;;  %v1481_v21 = vpop.permute.xlu1 %1480 }
 0x3e6   : > { %v1491_v58 = vsel %vm1154_vm2, %v1472_v15, %v1481_v21 }
 0x3e7   : > { %v1493_v24 = vsel %vm1492_vm3, %v1491_v58, %v1485_v18 }
 0x3e8   : > { %v1495_v26 = vsel %vm1494_vm4, %v1493_v24, %v1489_v22 }
 0x3e9   : > { %v1496_v28 = vpack.c.bf16 %v1495_v26, %v1495_v26 }
 0x3eb   : > { %1707 = vmatmul.msk.bf16.vlgmr.msra.gmra.mxu2 %vm415_vm0, %v1496_v28 }
 0x46e   : > { %v1545_v23 = vpop.f32.mrf.mxu2 }
 0x46f   : > { %v1546_v32 = vadd.f32 %v1747_v30, %v1545_v23 }
 0x471   : > { %v1550_v33 = vadd.f32 %v1549_v13, %v1546_v32 }
 0x473   : > { %v1551_v37 = vpack.c.bf16 %v1550_v33, %v1550_v33 }
 0x475   : > { %1553 = vst.msk [vmem:[%s374_s20] sm:$0xf] %vm1552_vm5, %v1551_v37 }
 0x476   : > { %v1547_v8 = vpop.f32.mrf.mxu2 }
 0x477 PF: > { %s20_s13 = sadd.s32 1, %s1771_s13  }
 0x478   : > { %p17_p4 = scmp.ge.s32.totalorder %s20_s13, 4  }
 0x47a   :  { %19 = sbr.rel (!%p17_p4) target bundleno = 1 (0x1), region = 93 }

</bundles_post_ra>
